<compile_context>
chip_gen: v7x
topology: tpu7x:2x2x1
jax: 0.10.0
libtpu: 0.0.40
codegen_flags: <defaults>
</compile_context>

<pallas_src>
import functools

import jax
import jax.numpy as jnp
from jax.experimental import pallas as pl
from jax.experimental.pallas import tpu as pltpu


def _round_up(x, m):
    return ((x + m - 1) // m) * m


def _pick_block(n, cap):
    """Largest batch-block size keeping Pallas block shapes legal.

    Returns n when n <= cap (block covers the full axis), otherwise the largest
    multiple-of-8 divisor of n that is <= cap, falling back to n (one block).
    """
    if n <= cap:
        return n
    for b in range(cap, 7, -1):
        if b % 8 == 0 and n % b == 0:
            return b
    return n


def _pick_class_tile(cpad, f, budget_bytes=8 << 20):
    """Class-tile for update_cov: aliased cov tile is double-buffered on both
    input and output (~16*tc*f*f bytes).  Budget keeps v5e's 16 MiB scoped VMEM
    safe; prefer >=2 grid steps so v7x's second TensorCore gets work."""
    cands = [t for t in range(8, cpad + 1, 8) if cpad % t == 0]
    fit = [t for t in cands if 16 * t * f * f <= budget_bytes] or [cands[0]]
    two = [t for t in fit if cpad // t >= 2]
    return max(two) if two else max(fit)


# ---------------------------- Pallas kernels ----------------------------

def conv_gap_fc_kernel(xw_ref, wc_ref, bc_ref, wf_ref, bf_ref, feat_ref, out_ref):
    """3x3 'same' conv + bias + ReLU + global-avg-pool + fc for a block of images.

    xw_ref : (bn, H+2, W, 3*Cin) bf16  column(dj)-shifted padded rows
    wc_ref : (3, 3*Cin, F)       bf16  conv weight, row-shift(di) major
    bc_ref : (1, F)  f32
    wf_ref : (Cp, F) bf16  fc weight (PyTorch layout, contracted on F: no transpose)
    bf_ref : (1, Cp) f32
    feat_ref: (bn, F)  f32  pooled features
    out_ref : (bn, Cp) f32  logits (lane-dense, Cp is a multiple of 128)
    """
    bn = xw_ref.shape[0]
    h = xw_ref.shape[1] - 2
    w = xw_ref.shape[2]
    pix = h * w

    x = xw_ref[...]                                       # load block once
    acc = None
    for di in range(3):                                   # row shifts in-kernel
        slab = x[:, di:di + h, :, :]                      # (bn, H, W, 3Cin) major-dim slice
        slab2 = slab.reshape(bn * pix, slab.shape[-1])    # (bn*H*W, 3Cin)
        part = jnp.dot(slab2, wc_ref[di], preferred_element_type=jnp.float32)
        acc = part if acc is None else acc + part         # (bn*H*W, F) f32
    y = jnp.maximum(acc + bc_ref[...], 0.0)               # conv bias + ReLU

    # Global average pool as one MXU matmul with an in-kernel block pooling
    # matrix (avoids middle-axis reductions; fine for modest bn*H*W).
    r = jax.lax.broadcasted_iota(jnp.int32, (bn, bn * pix), 1)
    s = jax.lax.broadcasted_iota(jnp.int32, (bn, bn * pix), 0)
    pool = jnp.where((r >= s * pix) & (r < (s + 1) * pix), 1.0 / pix, 0.0)
    feat = jnp.dot(pool, y, preferred_element_type=jnp.float32)   # (bn, F)
    feat_ref[...] = feat

    out_ref[...] = jax.lax.dot_general(                    # fused fc: (bn,F) x (Cp,F)^T
        feat.astype(jnp.bfloat16), wf_ref[...],
        (((1,), (1,)), ((), ())), preferred_element_type=jnp.float32) + bf_ref[...]


def update_cov_kernel(feat_ref, oht_ref, cov_ref, mean_ref, num_ref,
                      cov_out, mean_out, num_out):
    """One class-tile per grid step.  All blending arithmetic stays f32.

    feat_ref: (N, F); oht_ref: (tc, N); cov_ref: (tc, F, F);
    mean_ref: (tc, F); num_ref: (tc, 1)
    """
    feats = feat_ref[...]
    oht = oht_ref[...]
    nums_b = jnp.sum(oht, axis=1, keepdims=True)                  # (tc, 1)
    nums_b = jnp.where(nums_b == 0.0, 1.0, nums_b)                # spec: nums[nums==0]=1
    inv_nb = pl.reciprocal(nums_b)                                # exact, tiny tile

    sums = jnp.dot(oht, feats, preferred_element_type=jnp.float32)  # (tc, F)  MXU
    means_b = sums * inv_nb
    # centered + masked features, bounded by the class-tile size tc (not C)
    fa2 = (feats[None, :, :] - means_b[:, None, :]) * oht[:, :, None]   # (tc, N, F)
    cov_b = jax.lax.dot_general(                                   # batched A^T A (MXU)
        fa2, fa2, (((1,), (1,)), ((0,), (0,))),
        preferred_element_type=jnp.float32) * inv_nb[:, :, None]   # (tc, F, F)

    nums_o = num_ref[...]
    denom = nums_o + nums_b
    inv_d = pl.reciprocal(denom)
    cov_o = cov_ref[...]
    means_o = mean_ref[...]
    diff = means_o - means_b                                       # (tc, F)
    w2 = (nums_o * nums_b) * inv_d * inv_d                         # (tc, 1)

    # fused part1 + part2: reciprocal-multiplies, single pass over the tile
    cov_out[...] = ((nums_o[:, :, None] * cov_o + nums_b[:, :, None] * cov_b)
                    * inv_d[:, :, None]
                    + (w2[:, :, None] * diff[:, :, None]) * diff[:, None, :])
    mean_out[...] = (nums_o * means_o + nums_b * means_b) * inv_d
    num_out[...] = denom


def isda_aug_kernel(lab_ref, lev_ref, w_ref, cov_ref, outs_ref, aug_ref):
    """ISDA augmented logits for a BLOCK of samples per grid step.

    lab_ref : (N,) int32 in SMEM (scalar prefetch)
    lev_ref : (1, 1) f32 in SMEM (leverage; per-epoch changes never recompile)
    w_ref   : (Cp, F) f32   full fc weight, resident
    cov_ref : (C8, F, F) f32 full class covariances, resident
    outs_ref / aug_ref: (bn, Cp) f32 (lane-dense)
    """
    bn = outs_ref.shape[0]
    base = pl.program_id(0) * bn
    lev = lev_ref[0, 0]
    w = w_ref[...]                                         # (Cp, F)
    for s in range(bn):                                    # static unroll over the block
        lab = lab_ref[base + s]
        wlab = w_ref[pl.ds(lab, 1), :]                     # (1, F)  W[label]
        wt = w - wlab                                      # (Cp, F) f32 (v5e-safe VPU)
        cov_s = cov_ref[lab]                               # (F, F)  cov[label]
        t = jnp.dot(wt.astype(jnp.bfloat16), cov_s.astype(jnp.bfloat16),
                    preferred_element_type=jnp.float32)    # (Cp, F) MXU
        part2 = jnp.sum(t * wt, axis=-1)                   # (Cp,)
        aug_ref[pl.ds(s, 1), :] = outs_ref[pl.ds(s, 1), :] + part2[None, :] * lev


# ---------------------------- pallas_call wrappers ----------------------------

def _shifted_rows(x_nchw):
    """NCHW -> padded NHWC with the 3 column(dj) shifts folded into the last dim:
    xw[n, r, w, dj*Cin + c] = pad(x)[n, r, w + dj, c].   (3x, not 9x; bf16.)"""
    x = jnp.transpose(x_nchw, (0, 2, 3, 1))                # NCHW -> NHWC
    n, h, w, cin = x.shape
    xp = jnp.pad(x, ((0, 0), (1, 1), (1, 1), (0, 0)))
    xw = jnp.concatenate([xp[:, :, dj:dj + w, :] for dj in range(3)], axis=-1)
    return xw.astype(jnp.bfloat16)                         # (N, H+2, W, 3*Cin)


def conv_gap_fc_call(xw, wc, bc, wf, bf):
    n, hp2, w, k3 = xw.shape
    f = wc.shape[2]
    cp = wf.shape[0]
    bn = _pick_block(n, 16)                                # batch images per grid step
    feats, outs = pl.pallas_call(
        conv_gap_fc_kernel,
        out_shape=(jax.ShapeDtypeStruct((n, f), jnp.float32),
                   jax.ShapeDtypeStruct((n, cp), jnp.float32)),
        grid=(n // bn,),
        in_specs=[pl.BlockSpec((bn, hp2, w, k3), lambda i: (i, 0, 0, 0)),
                  pl.BlockSpec((3, k3, f), lambda i: (0, 0, 0)),
                  pl.BlockSpec((1, f), lambda i: (0, 0)),
                  pl.BlockSpec((cp, f), lambda i: (0, 0)),
                  pl.BlockSpec((1, cp), lambda i: (0, 0))],
        out_specs=(pl.BlockSpec((bn, f), lambda i: (i, 0)),
                   pl.BlockSpec((bn, cp), lambda i: (i, 0))),
        compiler_params=pltpu.CompilerParams(dimension_semantics=("parallel",)),
    )(xw, wc, bc, wf, bf)
    return feats, outs                                     # (N, F), (N, Cp)


def update_cov_call(feats, oht, cov, means, nums):
    n, f = feats.shape
    cpad = oht.shape[0]
    tc = _pick_class_tile(cpad, f)
    return pl.pallas_call(
        update_cov_kernel,
        out_shape=(jax.ShapeDtypeStruct((cpad, f, f), jnp.float32),
                   jax.ShapeDtypeStruct((cpad, f), jnp.float32),
                   jax.ShapeDtypeStruct((cpad, 1), jnp.float32)),
        grid=(cpad // tc,),
        in_specs=[pl.BlockSpec((n, f), lambda c: (0, 0)),
                  pl.BlockSpec((tc, n), lambda c: (c, 0)),
                  pl.BlockSpec((tc, f, f), lambda c: (c, 0, 0)),
                  pl.BlockSpec((tc, f), lambda c: (c, 0)),
                  pl.BlockSpec((tc, 1), lambda c: (c, 0))],
        out_specs=(pl.BlockSpec((tc, f, f), lambda c: (c, 0, 0)),
                   pl.BlockSpec((tc, f), lambda c: (c, 0)),
                   pl.BlockSpec((tc, 1), lambda c: (c, 0))),
        input_output_aliases={2: 0, 3: 1, 4: 2},           # in-place buffer update
        compiler_params=pltpu.CompilerParams(dimension_semantics=("parallel",)),
    )(feats, oht, cov, means, nums)


def isda_augment_call(labels, lev, w_pad, cov, outs_p):
    n = labels.shape[0]
    cp, f = w_pad.shape
    c8 = cov.shape[0]
    bn = _pick_block(n, 8)                                 # batch samples per grid step
    return pl.pallas_call(
        isda_aug_kernel,
        out_shape=jax.ShapeDtypeStruct((n, cp), jnp.float32),
        grid_spec=pltpu.PrefetchScalarGridSpec(
            num_scalar_prefetch=1,                         # labels -> SMEM
            grid=(n // bn,),
            in_specs=[
                pl.BlockSpec(memory_space=pltpu.MemorySpace.SMEM),    # leverage (1,1)
                pl.BlockSpec((cp, f), lambda i, lab: (0, 0)),         # full W (resident)
                pl.BlockSpec((c8, f, f), lambda i, lab: (0, 0, 0)),   # full cov (resident)
                pl.BlockSpec((bn, cp), lambda i, lab: (i, 0)),        # logits block
            ],
            out_specs=pl.BlockSpec((bn, cp), lambda i, lab: (i, 0)),
        ),
        compiler_params=pltpu.CompilerParams(dimension_semantics=("parallel",)),
    )(labels, lev, w_pad, cov, outs_p)


# ---------------------------- jitted forward functions ----------------------------

def _arch_fc(params, x):
    xw = _shifted_rows(x)
    return conv_gap_fc_call(xw,
                            params['conv_w'].astype(jnp.bfloat16),
                            params['conv_b'],
                            params['fc_w'].astype(jnp.bfloat16),
                            params['fc_b'])


@functools.partial(jax.jit, static_argnames=("num_classes",))
def isda_eval_forward(params, x, *, num_classes):
    _, outs_p = _arch_fc(params, x)
    return outs_p[:, :num_classes]


@functools.partial(jax.jit, static_argnames=("num_classes",))
def isda_train_forward(params, state, x, labels, lev, *, num_classes):
    feats, outs_p = _arch_fc(params, x)                    # (N, F), (N, Cp)

    # ---- cov / means / nums update (class-tiled kernel, in-place aliased) ----
    cpad = state['cov'].shape[0]
    oht = jax.nn.one_hot(labels, cpad, dtype=jnp.float32).T            # (Cpad, N)
    new_cov, new_means, new_nums = update_cov_call(
        feats, oht, state['cov'], state['means'], state['nums'])
    new_state = {'cov': new_cov, 'means': new_means, 'nums': new_nums}

    # ---- ISDA augmentation (sample-blocked kernel, in-kernel label gathers) ----
    aug_p = isda_augment_call(labels, lev, params['fc_w'], new_cov, outs_p)
    aug = aug_p[:, :num_classes]
    outs = outs_p[:, :num_classes]

    # TODO(synk): scalar cross-entropy reduction kept as (jitted) JAX glue.
    n = labels.shape[0]
    lse = jax.nn.logsumexp(aug, axis=1)
    nll = lse - aug[jnp.arange(n), labels]
    loss = jnp.mean(nll)
    return outs, loss, new_state


# ---------------------------- module wrapper ----------------------------

class ISDAWrapperPallas:
    """arch = Conv3x3(Cin->F, pad=1) + ReLU + GAP;  fc = Linear(F->C)."""

    def __init__(self, key, cin=4, dim_feature=32, num_classes=8,
                 leverage=0.5, epochs=200):
        self.leverage = leverage / 2
        self.epochs = epochs
        self.dim_feature = dim_feature
        self.num_classes = num_classes

        fp = _round_up(dim_feature, 8)       # sublane-rounded feature dim (NOT 128)
        cp = _round_up(num_classes, 128)     # lane-dense logits dim
        c8 = _round_up(num_classes, 8)       # class axis of the ISDA buffers
        self.fp, self.cp, self.c8 = fp, cp, c8

        k1, k2 = jax.random.split(key)
        conv_w = jax.random.normal(k1, (3, 3 * cin, dim_feature), jnp.float32) * 0.1
        fc_w = jax.random.normal(k2, (num_classes, dim_feature), jnp.float32) * 0.1
        # zero-padded params (padded rows/cols contribute nothing to real slices)
        self.params = {
            'conv_w': jnp.zeros((3, 3 * cin, fp), jnp.float32)
                        .at[:, :, :dim_feature].set(conv_w),
            'conv_b': jnp.zeros((1, fp), jnp.float32),
            'fc_w': jnp.zeros((cp, fp), jnp.float32)
                      .at[:num_classes, :dim_feature].set(fc_w),
            'fc_b': jnp.zeros((1, cp), jnp.float32),
        }
        # ISDA buffers (class-major layout of PyTorch cov/means/nums buffers)
        self.state = {
            'cov': jnp.zeros((c8, fp, fp), jnp.float32),
            'means': jnp.zeros((c8, fp), jnp.float32),
            'nums': jnp.zeros((c8, 1), jnp.float32),
        }

    def forward(self, inputs, labels=None, cur_epoch=None, training=False):
        if training:
            lev = jnp.asarray(self.leverage * cur_epoch / self.epochs,
                              jnp.float32).reshape(1, 1)
            outs, loss, new_state = isda_train_forward(
                self.params, self.state, inputs, labels, lev,
                num_classes=self.num_classes)
            self.state = new_state
            return outs, loss
        return isda_eval_forward(self.params, inputs, num_classes=self.num_classes)


# ---------------------------- demo / self-check ----------------------------

if __name__ == "__main__":
    key = jax.random.PRNGKey(0)
    kx, kp = jax.random.split(key)
    N, Cin, H, W = 4, 4, 16, 16
    Fdim, C = 32, 8
    x = jax.random.normal(kx, (N, Cin, H, W), jnp.float32)   # NCHW (PyTorch conv layout)
    labels = jnp.array([1, 3, 3, 1], dtype=jnp.int32)

    model = ISDAWrapperPallas(kp, cin=Cin, dim_feature=Fdim, num_classes=C,
                              leverage=0.5, epochs=200)

    # unpadded views of the params for the pure-JAX reference
    conv_w = model.params['conv_w'][:, :, :Fdim].reshape(3, 3, Cin, Fdim)
    conv_b = model.params['conv_b'][:, :Fdim]
    fc_w = model.params['fc_w'][:C, :Fdim]
    fc_b = model.params['fc_b'][:, :C]

    # ----- eval-mode forward (logits only, as in PyTorch eval) -----
    outs = model.forward(x, training=False)
    jax.block_until_ready(outs)

    x_nhwc = jnp.transpose(x, (0, 2, 3, 1))
    xpad = jnp.pad(x_nhwc, ((0, 0), (1, 1), (1, 1), (0, 0)))
    acc = jnp.zeros((N, H, W, Fdim), jnp.float32)
    for di in range(3):
        for dj in range(3):
            acc = acc + jnp.einsum('nhwc,cf->nhwf',
                                   xpad[:, di:di + H, dj:dj + W, :], conv_w[di, dj],
                                   precision=jax.lax.Precision.HIGHEST)
    feats_ref = jnp.maximum(acc + conv_b[0], 0.0).mean(axis=(1, 2))
    outs_ref = feats_ref @ fc_w.T + fc_b
    assert jnp.allclose(outs, outs_ref, atol=1e-2, rtol=1e-2), "eval forward mismatch"

    # ----- training-mode forward (updates cov/means/nums, returns (outs, loss)) -----
    cur_epoch = 10
    outs_tr, loss = model.forward(x, labels=labels, cur_epoch=cur_epoch, training=True)
    jax.block_until_ready((outs_tr, loss, model.state['cov']))

    # pure-JAX reference of the ISDA update (literal spec, class-major layout)
    oh = jax.nn.one_hot(labels, C, dtype=jnp.float32)                 # (N, C)
    nums_b = oh.sum(axis=0)
    nums_b = jnp.where(nums_b == 0.0, 1.0, nums_b)
    fa = oh.T[:, :, None] * feats_ref[None, :, :]                     # (C, N, F)
    means_b = fa.sum(axis=1) / nums_b[:, None]
    fa2 = (fa - means_b[:, None, :]) * oh.T[:, :, None]
    cov_b = jnp.einsum('cni,cnj->cij', fa2, fa2,
                       precision=jax.lax.Precision.HIGHEST) / nums_b[:, None, None]
    nums_o = jnp.zeros((C,)); cov_o = jnp.zeros((C, Fdim, Fdim)); means_o = jnp.zeros((C, Fdim))
    denom = nums_o + nums_b
    part1 = (nums_o[:, None, None] * cov_o + nums_b[:, None, None] * cov_b) / denom[:, None, None]
    tmpv = means_o - means_b
    part2 = (nums_o * nums_b)[:, None, None] * tmpv[:, :, None] * tmpv[:, None, :] / (denom ** 2)[:, None, None]
    cov_new_ref = part1 + part2
    means_new_ref = (nums_o[:, None] * means_o + nums_b[:, None] * means_b) / denom[:, None]
    nums_new_ref = denom

    assert jnp.allclose(model.state['cov'][:C, :Fdim, :Fdim], cov_new_ref,
                        atol=1e-2, rtol=1e-2), "cov update mismatch"
    assert jnp.allclose(model.state['means'][:C, :Fdim], means_new_ref,
                        atol=1e-2, rtol=1e-2), "means update mismatch"
    assert jnp.allclose(model.state['nums'][:C, 0], nums_new_ref,
                        atol=1e-3), "nums update mismatch"

    # reference augmented loss
    lev_ref = model.leverage * cur_epoch / model.epochs
    wl = fc_w[labels]                                                  # (N, F)
    wt_ref = fc_w[None, :, :] - wl[:, None, :]                         # (N, C, F)
    covs_n = cov_new_ref[labels]                                       # (N, F, F)
    p2_ref = jnp.einsum('ncf,nfg,ncg->nc', wt_ref, covs_n, wt_ref,
                        precision=jax.lax.Precision.HIGHEST)
    aug_ref = outs_ref + p2_ref * lev_ref
    lse = jax.nn.logsumexp(aug_ref, axis=1)
    loss_ref = jnp.mean(lse - aug_ref[jnp.arange(N), labels])

    assert jnp.allclose(outs_tr, outs_ref, atol=1e-2, rtol=1e-2), "train logits mismatch"
    assert jnp.allclose(loss, loss_ref, atol=1e-2, rtol=1e-2), "ISDA loss mismatch"

    print("KERNEL_OK")
</pallas_src>

<mosaic_0001>
module attributes {stable_mosaic.version = 11 : i64} {
  func.func @conv_gap_fc_kernel(%arg0: i32, %arg1: memref<4x18x16x12xbf16, #tpu.memory_space<vmem>>, %arg2: memref<3x12x32xbf16, #tpu.memory_space<vmem>>, %arg3: memref<1x32xf32, #tpu.memory_space<vmem>>, %arg4: memref<128x32xbf16, #tpu.memory_space<vmem>>, %arg5: memref<1x128xf32, #tpu.memory_space<vmem>>, %arg6: memref<4x32xf32, #tpu.memory_space<vmem>>, %arg7: memref<4x128xf32, #tpu.memory_space<vmem>>) attributes {dimension_semantics = [#tpu.dimension_semantics<parallel>], iteration_bounds = array<i64: 1>, scalar_prefetch = 0 : i64, scratch_operands = 0 : i64, tpu.core_type = #tpu.core_type<tc>, window_params = [{transform_indices = @transform_0, window_bounds = array<i64: 4, 18, 16, 12>}, {pipeline_mode = #tpu.pipeline_mode<synchronous>, transform_indices = @transform_1, window_bounds = array<i64: 3, 12, 32>}, {pipeline_mode = #tpu.pipeline_mode<synchronous>, transform_indices = @transform_2, window_bounds = array<i64: 1, 32>}, {pipeline_mode = #tpu.pipeline_mode<synchronous>, transform_indices = @transform_3, window_bounds = array<i64: 128, 32>}, {pipeline_mode = #tpu.pipeline_mode<synchronous>, transform_indices = @transform_4, window_bounds = array<i64: 1, 128>}, {transform_indices = @transform_5, window_bounds = array<i64: 4, 32>}, {transform_indices = @transform_6, window_bounds = array<i64: 4, 128>}]} {
    %c0 = arith.constant 0 : index
    %c0_0 = arith.constant 0 : index
    %c0_1 = arith.constant 0 : index
    %c0_2 = arith.constant 0 : index
    %0 = vector.load %arg1[%c0, %c0_0, %c0_1, %c0_2] : memref<4x18x16x12xbf16, #tpu.memory_space<vmem>>, vector<4x18x16x12xbf16>
    %1 = vector.extract_strided_slice %0 {offsets = [0, 0, 0, 0], sizes = [4, 16, 16, 12], strides = [1, 1, 1, 1]} : vector<4x18x16x12xbf16> to vector<4x16x16x12xbf16>
    %2 = vector.shape_cast %1 : vector<4x16x16x12xbf16> to vector<1024x12xbf16>
    %c0_3 = arith.constant 0 : index
    %c0_4 = arith.constant 0 : index
    %c0_5 = arith.constant 0 : index
    %3 = vector.load %arg2[%c0_3, %c0_4, %c0_5] : memref<3x12x32xbf16, #tpu.memory_space<vmem>>, vector<1x12x32xbf16>
    %4 = vector.shape_cast %3 : vector<1x12x32xbf16> to vector<12x32xbf16>
    %cst = arith.constant dense<0.000000e+00> : vector<1024x32xf32>
    %5 = tpu.matmul %2, %4, %cst {dimension_numbers = #tpu.dot_dimension_numbers<[1], [0], [0], [1], [0, 0, 1, 1], [], []>} : vector<1024x12xbf16>, vector<12x32xbf16>, vector<1024x32xf32> -> vector<1024x32xf32>
    %6 = vector.extract_strided_slice %0 {offsets = [0, 1, 0, 0], sizes = [4, 16, 16, 12], strides = [1, 1, 1, 1]} : vector<4x18x16x12xbf16> to vector<4x16x16x12xbf16>
    %7 = vector.shape_cast %6 : vector<4x16x16x12xbf16> to vector<1024x12xbf16>
    %c1 = arith.constant 1 : index
    %c0_6 = arith.constant 0 : index
    %c0_7 = arith.constant 0 : index
    %8 = vector.load %arg2[%c1, %c0_6, %c0_7] : memref<3x12x32xbf16, #tpu.memory_space<vmem>>, vector<1x12x32xbf16>
    %9 = vector.shape_cast %8 : vector<1x12x32xbf16> to vector<12x32xbf16>
    %cst_8 = arith.constant dense<0.000000e+00> : vector<1024x32xf32>
    %10 = tpu.matmul %7, %9, %cst_8 {dimension_numbers = #tpu.dot_dimension_numbers<[1], [0], [0], [1], [0, 0, 1, 1], [], []>} : vector<1024x12xbf16>, vector<12x32xbf16>, vector<1024x32xf32> -> vector<1024x32xf32>
    %11 = arith.addf %5, %10 : vector<1024x32xf32>
    %12 = vector.extract_strided_slice %0 {offsets = [0, 2, 0, 0], sizes = [4, 16, 16, 12], strides = [1, 1, 1, 1]} : vector<4x18x16x12xbf16> to vector<4x16x16x12xbf16>
    %13 = vector.shape_cast %12 : vector<4x16x16x12xbf16> to vector<1024x12xbf16>
    %c2 = arith.constant 2 : index
    %c0_9 = arith.constant 0 : index
    %c0_10 = arith.constant 0 : index
    %14 = vector.load %arg2[%c2, %c0_9, %c0_10] : memref<3x12x32xbf16, #tpu.memory_space<vmem>>, vector<1x12x32xbf16>
    %15 = vector.shape_cast %14 : vector<1x12x32xbf16> to vector<12x32xbf16>
    %cst_11 = arith.constant dense<0.000000e+00> : vector<1024x32xf32>
    %16 = tpu.matmul %13, %15, %cst_11 {dimension_numbers = #tpu.dot_dimension_numbers<[1], [0], [0], [1], [0, 0, 1, 1], [], []>} : vector<1024x12xbf16>, vector<12x32xbf16>, vector<1024x32xf32> -> vector<1024x32xf32>
    %17 = arith.addf %11, %16 : vector<1024x32xf32>
    %c0_12 = arith.constant 0 : index
    %c0_13 = arith.constant 0 : index
    %18 = vector.load %arg3[%c0_12, %c0_13] : memref<1x32xf32, #tpu.memory_space<vmem>>, vector<1x32xf32>
    %19 = vector.broadcast %18 : vector<1x32xf32> to vector<1024x32xf32>
    %20 = arith.addf %17, %19 : vector<1024x32xf32>
    %cst_14 = arith.constant 0.000000e+00 : f32
    %21 = vector.broadcast %cst_14 : f32 to vector<1024x32xf32>
    %22 = arith.maximumf %20, %21 : vector<1024x32xf32>
    %23 = tpu.iota {dimensions = array<i32: 1>} : vector<4x1024xi32>
    %24 = tpu.iota {dimensions = array<i32: 0>} : vector<4x1024xi32>
    %c256_i32 = arith.constant 256 : i32
    %25 = vector.broadcast %c256_i32 : i32 to vector<4x1024xi32>
    %26 = arith.muli %24, %25 : vector<4x1024xi32>
    %27 = arith.cmpi sge, %23, %26 : vector<4x1024xi32>
    %c1_i32 = arith.constant 1 : i32
    %28 = vector.broadcast %c1_i32 : i32 to vector<4x1024xi32>
    %29 = arith.addi %24, %28 : vector<4x1024xi32>
    %c256_i32_15 = arith.constant 256 : i32
    %30 = vector.broadcast %c256_i32_15 : i32 to vector<4x1024xi32>
    %31 = arith.muli %29, %30 : vector<4x1024xi32>
    %32 = arith.cmpi slt, %23, %31 : vector<4x1024xi32>
    %33 = arith.andi %27, %32 : vector<4x1024xi1>
    %cst_16 = arith.constant 3.906250e-03 : f32
    %cst_17 = arith.constant 0.000000e+00 : f32
    %34 = vector.broadcast %cst_16 : f32 to vector<4x1024xf32>
    %35 = vector.broadcast %cst_17 : f32 to vector<4x1024xf32>
    %36 = arith.select %33, %34, %35 : vector<4x1024xi1>, vector<4x1024xf32>
    %cst_18 = arith.constant dense<0.000000e+00> : vector<4x32xf32>
    %37 = tpu.matmul %36, %22, %cst_18 {dimension_numbers = #tpu.dot_dimension_numbers<[1], [0], [0], [1], [0, 0, 1, 1], [], []>} : vector<4x1024xf32>, vector<1024x32xf32>, vector<4x32xf32> -> vector<4x32xf32>
    %c0_19 = arith.constant 0 : index
    %c0_20 = arith.constant 0 : index
    %38 = vector.load %arg6[%c0_19, %c0_20] : memref<4x32xf32, #tpu.memory_space<vmem>>, vector<4x32xf32>
    tpu.vector_store %arg6[%c0_19, %c0_20], %37 {strides = array<i32>} : memref<4x32xf32, #tpu.memory_space<vmem>>, vector<4x32xf32>,
    %39 = arith.truncf %37 : vector<4x32xf32> to vector<4x32xbf16>
    %c0_21 = arith.constant 0 : index
    %c0_22 = arith.constant 0 : index
    %40 = vector.load %arg4[%c0_21, %c0_22] : memref<128x32xbf16, #tpu.memory_space<vmem>>, vector<128x32xbf16>
    %cst_23 = arith.constant dense<0.000000e+00> : vector<4x128xf32>
    %41 = tpu.matmul %39, %40, %cst_23 {dimension_numbers = #tpu.dot_dimension_numbers<[1], [1], [0], [0], [0, 0, 1, 0], [], []>} : vector<4x32xbf16>, vector<128x32xbf16>, vector<4x128xf32> -> vector<4x128xf32>
    %c0_24 = arith.constant 0 : index
    %c0_25 = arith.constant 0 : index
    %42 = vector.load %arg5[%c0_24, %c0_25] : memref<1x128xf32, #tpu.memory_space<vmem>>, vector<1x128xf32>
    %43 = vector.broadcast %42 : vector<1x128xf32> to vector<4x128xf32>
    %44 = arith.addf %41, %43 : vector<4x128xf32>
    %c0_26 = arith.constant 0 : index
    %c0_27 = arith.constant 0 : index
    %45 = vector.load %arg7[%c0_26, %c0_27] : memref<4x128xf32, #tpu.memory_space<vmem>>, vector<4x128xf32>
    tpu.vector_store %arg7[%c0_26, %c0_27], %44 {strides = array<i32>} : memref<4x128xf32, #tpu.memory_space<vmem>>, vector<4x128xf32>,
    return
  }
  func.func @transform_0(%arg0: i32) -> (i32, i32, i32, i32) {
    %c0_i32 = arith.constant 0 : i32
    %c0_i32_0 = arith.constant 0 : i32
    %c0_i32_1 = arith.constant 0 : i32
    %c0_i32_2 = arith.constant 0 : i32
    return %arg0, %c0_i32, %c0_i32_0, %c0_i32_1 : i32, i32, i32, i32
  }
  func.func @transform_1(%arg0: i32) -> (i32, i32, i32) {
    %c0_i32 = arith.constant 0 : i32
    %c0_i32_0 = arith.constant 0 : i32
    %c0_i32_1 = arith.constant 0 : i32
    %c0_i32_2 = arith.constant 0 : i32
    return %c0_i32, %c0_i32_0, %c0_i32_1 : i32, i32, i32
  }
  func.func @transform_2(%arg0: i32) -> (i32, i32) {
    %c0_i32 = arith.constant 0 : i32
    %c0_i32_0 = arith.constant 0 : i32
    %c0_i32_1 = arith.constant 0 : i32
    return %c0_i32, %c0_i32_0 : i32, i32
  }
  func.func @transform_3(%arg0: i32) -> (i32, i32) {
    %c0_i32 = arith.constant 0 : i32
    %c0_i32_0 = arith.constant 0 : i32
    %c0_i32_1 = arith.constant 0 : i32
    return %c0_i32, %c0_i32_0 : i32, i32
  }
  func.func @transform_4(%arg0: i32) -> (i32, i32) {
    %c0_i32 = arith.constant 0 : i32
    %c0_i32_0 = arith.constant 0 : i32
    %c0_i32_1 = arith.constant 0 : i32
    return %c0_i32, %c0_i32_0 : i32, i32
  }
  func.func @transform_5(%arg0: i32) -> (i32, i32) {
    %c0_i32 = arith.constant 0 : i32
    %c0_i32_0 = arith.constant 0 : i32
    return %arg0, %c0_i32 : i32, i32
  }
  func.func @transform_6(%arg0: i32) -> (i32, i32) {
    %c0_i32 = arith.constant 0 : i32
    %c0_i32_0 = arith.constant 0 : i32
    return %arg0, %c0_i32 : i32, i32
  }
}

</mosaic_0001>

<bundles_post_ra>
// kernel: isda_eval_forward.1
= control target key start
LH: loop header
LB: loop body
LE: loop exit
PB: predicated region body
PF: predicated region fallthrough
CT: control target
= control target key end

     0   :  { %12 = vsyncpa [#allocation3], 0  ;;  %vm692_vm0 = vcmask 1045504   ;;  %vm499_vm1 = vcmask 97280   ;;  %s6342_s0 = inlined_call_operand.vmem [shape: bf16[4,18,16,12], index: 0, kind: input, shape index: {}]   ;;  %s6343_s1 = inlined_call_operand.vmem [shape: bf16[3,12,32], index: 1, kind: input, shape index: {}]   ;;  %s6344_s2 = inlined_call_operand.vmem [shape: f32[1,32], index: 2, kind: input, shape index: {}]   ;;  %s6345_s3 = inlined_call_operand.vmem [shape: bf16[128,32], index: 3, kind: input, shape index: {}]   ;;  %s6346_s4 = inlined_call_operand.vmem [shape: f32[1,128], index: 4, kind: input, shape index: {}]   ;;  %s6347_s5 = inlined_call_operand.hbm [shape: f32[4,32], index: 5, kind: output, shape index: {0}]   ;;  %s6348_s6 = inlined_call_operand.hbm [shape: f32[4,128], index: 6, kind: output, shape index: {1}]  }
   0x1   :  { %v4733_v0 = vld [vmem:[%s6343_s1] sm:$0x3f]   ;;  %v4735_v3 = vld [vmem:[%s6342_s0 + $0x8] sm:$0xff]   ;;  %v4736_v4 = vld [vmem:[%s6343_s1 + $0x10] sm:$0x3f]  }
   0x2   :  { %v4734_v1 = vld [vmem:[%s6342_s0] sm:$0xff]   ;;  %4725 = vmatprep.subr.msk.bf16.mxu0 %vm692_vm0, %v4733_v0  ;;  %v1279_v2 = vsel %vm692_vm0, %v4733_v0, 0  ;;  %v4923_v5 = vld [vmem:[%s6342_s0 + $0x10] sm:$0xff]   ;;  %3930 = vmatprep.mubr.msk.bf16.mxu1 %vm499_vm1, %v4735_v3  ;;  %v1867_v6 = vsel %vm692_vm0, %v4736_v4, 0  ;;  %v4934_v7 = vld [vmem:[%s6342_s0 + $0x18] sm:$0xff]  }
   0x3   :  { %4059 = vmatpush3.bf16.msra.mxu0 %v1279_v2  ;;  %4060 = vmatprep.mubr.msk.bf16.mxu0 %vm499_vm1, %v4734_v1  ;;  %v4939_v8 = vld [vmem:[%s6342_s0 + $0x20] sm:$0xff]   ;;  %v4948_v9 = vld [vmem:[%s6342_s0 + $0x28] sm:$0xff]   ;;  %v4953_v10 = vld [vmem:[%s6342_s0 + $0x30] sm:$0xff]  }
   0x4   :  { %4727 = vmatprep.subr.msk.bf16.mxu0 %vm692_vm0, %v4736_v4  ;;  %v4962_v11 = vld [vmem:[%s6342_s0 + $0x38] sm:$0xff]   ;;  %v4967_v12 = vld [vmem:[%s6342_s0 + $0x40] sm:$0xff]   ;;  %v4976_v13 = vld [vmem:[%s6342_s0 + $0x48] sm:$0xff]  }
   0x5   :  { %v4981_v14 = vld [vmem:[%s6342_s0 + $0x50] sm:$0xff]   ;;  %v4769_v15 = vld [vmem:[%s6343_s1 + $0x8] sm:$0x3f]   ;;  %v4996_v17 = vld [vmem:[%s6342_s0 + $0x58] sm:$0xff]  }
   0x6   :  { %4061 = vmatmul.mubr.msk.bf16.vlgmr.msra.gmra.mrb[0].mxu0 %vm499_vm1, %v4735_v3  ;;  %4724 = vmatprep.subr.msk.bf16.mxu1 %vm692_vm0, %v4769_v15  ;;  %v694_v16 = vsel %vm692_vm0, %v4769_v15, 0  ;;  %v5003_v18 = vld [vmem:[%s6342_s0 + $0x60] sm:$0xff]   ;;  %v5014_v19 = vld [vmem:[%s6342_s0 + $0x68] sm:$0xff]   ;;  %v5019_v20 = vld [vmem:[%s6342_s0 + $0x70] sm:$0xff]  }
   0x7   :  { %4189 = vmatpush3.bf16.msra.mxu0 %v1867_v6  ;;  %4064 = vmatprep.mubr.msk.bf16.mxu0 %vm499_vm1, %v4923_v5  ;;  %v5032_v21 = vld [vmem:[%s6342_s0 + $0x78] sm:$0xff]   ;;  %v4751_v22 = vld [vmem:[%s6342_s0 + $0x90] sm:$0xff]   ;;  %v5050_v24 = vld [vmem:[%s6342_s0 + $0xa0] sm:$0xff]  }
   0x8   :  { %3929 = vmatpush3.bf16.msra.mxu1 %v694_v16  ;;  %v4752_v23 = vld [vmem:[%s6342_s0 + $0x98] sm:$0xff]  }
   0x9   :  { %4726 = vmatprep.subr.msk.bf16.mxu1 %vm692_vm0, %v4733_v0 }
   0xb   :  { %3931 = vmatmul.mubr.msk.bf16.vlgmr.msra.gmra.mrb[0].mxu1 %vm499_vm1, %v4923_v5 }
   0xc   :  { %3934 = vmatprep.mubr.msk.bf16.mxu1 %vm499_vm1, %v4934_v7  ;;  %4467 = vmatpush3.bf16.msra.mxu1 %v1279_v2 }
   0xe   :  { %4065 = vmatmul.mubr.msk.bf16.gmra.mrb[4].mxu0 %vm499_vm1, %v4934_v7 }
   0xf   :  { %4068 = vmatprep.mubr.msk.bf16.mxu0 %vm499_vm1, %v4939_v8 }
  0x13   :  { %3935 = vmatmul.mubr.msk.bf16.gmra.mrb[4].mxu1 %vm499_vm1, %v4939_v8 }
  0x14   :  { %3938 = vmatprep.mubr.msk.bf16.mxu1 %vm499_vm1, %v4948_v9 }
  0x16   :  { %4069 = vmatmul.mubr.msk.bf16.gmra.mrb[8].mxu0 %vm499_vm1, %v4948_v9 }
  0x17   :  { %4072 = vmatprep.mubr.msk.bf16.mxu0 %vm499_vm1, %v4953_v10 }
  0x1b   :  { %3939 = vmatmul.mubr.msk.bf16.gmra.mrb[8].mxu1 %vm499_vm1, %v4953_v10 }
  0x1c   :  { %3942 = vmatprep.mubr.msk.bf16.mxu1 %vm499_vm1, %v4962_v11 }
  0x1e   :  { %4073 = vmatmul.mubr.msk.bf16.gmra.mrb[12].mxu0 %vm499_vm1, %v4962_v11 }
  0x1f   :  { %4076 = vmatprep.mubr.msk.bf16.mxu0 %vm499_vm1, %v4967_v12 }
  0x23   :  { %3943 = vmatmul.mubr.msk.bf16.gmra.mrb[12].mxu1 %vm499_vm1, %v4967_v12 }
  0x24   :  { %3946 = vmatprep.mubr.msk.bf16.mxu1 %vm499_vm1, %v4976_v13 }
  0x26   :  { %4077 = vmatmul.mubr.msk.bf16.gmra.mrb[16].mxu0 %vm499_vm1, %v4976_v13 }
  0x27   :  { %4080 = vmatprep.mubr.msk.bf16.mxu0 %vm499_vm1, %v4981_v14 }
  0x2e   :  { %4081 = vmatmul.mubr.msk.bf16.gmra.mrb[20].mxu0 %vm499_vm1, %v4996_v17 }
  0x2f   :  { %4084 = vmatprep.mubr.msk.bf16.mxu0 %vm499_vm1, %v5003_v18 }
  0x36   :  { %4085 = vmatmul.mubr.msk.bf16.gmra.mrb[24].mxu0 %vm499_vm1, %v5014_v19 }
  0x37   :  { %4088 = vmatprep.mubr.msk.bf16.mxu0 %vm499_vm1, %v5019_v20 }
  0x3e   :  { %4089 = vmatmul.mubr.msk.bf16.gmra.mrb[28].mxu0 %vm499_vm1, %v5032_v21 }
  0x3f   :  { %4092 = vmatprep.mubr.msk.bf16.mxu0 %vm499_vm1, %v4751_v22 }
  0x46   :  { %4093 = vmatmul.mubr.msk.bf16.gmra.mrb[32].mxu0 %vm499_vm1, %v4752_v23 }
  0x47   :  { %4096 = vmatprep.mubr.msk.bf16.mxu0 %vm499_vm1, %v5050_v24 }
  0x48   :  { %13 = vsyncpa [#allocation5], 0  ;;  %v5062_v25 = vld [vmem:[%s6342_s0 + $0xa8] sm:$0xff]   ;;  %3947 = vmatmul.mubr.msk.bf16.gmra.mrb[16].mxu1 %vm499_vm1, %v4981_v14  ;;  %v5069_v26 = vld [vmem:[%s6342_s0 + $0xb0] sm:$0xff]  }
  0x49   :  { %3950 = vmatprep.mubr.msk.bf16.mxu1 %vm499_vm1, %v4996_v17  ;;  %v5080_v27 = vld [vmem:[%s6342_s0 + $0xb8] sm:$0xff]   ;;  %v5087_v28 = vld [vmem:[%s6342_s0 + $0xc0] sm:$0xff]   ;;  %v5098_v29 = vld [vmem:[%s6342_s0 + $0xc8] sm:$0xff]  }
  0x4a   :  { %v5105_v30 = vld [vmem:[%s6342_s0 + $0xd0] sm:$0xff]   ;;  %v5114_v31 = vld [vmem:[%s6342_s0 + $0x80] sm:$0xff]   ;;  %v5121_v32 = vld [vmem:[%s6342_s0 + $0xd8] sm:$0xff]  }
  0x4b   :  { %v5128_v33 = vld [vmem:[%s6342_s0 + $0xe0] sm:$0xff]   ;;  %v5138_v34 = vld [vmem:[%s6342_s0 + $0xe8] sm:$0xff]   ;;  %v5145_v35 = vld [vmem:[%s6342_s0 + $0xf0] sm:$0xff]  }
  0x4c   :  { %v5156_v36 = vld [vmem:[%s6342_s0 + $0xf8] sm:$0xff]   ;;  %v5163_v37 = vld [vmem:[%s6342_s0 + $0x100] sm:$0xff]   ;;  %v5174_v38 = vld [vmem:[%s6342_s0 + $0x108] sm:$0xff]  }
  0x4d   :  { %v4767_v39 = vld [vmem:[%s6342_s0 + $0x120] sm:$0xff]   ;;  %v4768_v40 = vld [vmem:[%s6342_s0 + $0x128] sm:$0xff]   ;;  %v5194_v41 = vld [vmem:[%s6342_s0 + $0x130] sm:$0xff]  }
  0x4e   :  { %4097 = vmatmul.mubr.msk.bf16.gmra.mrb[36].mxu0 %vm499_vm1, %v5062_v25  ;;  %v5204_v42 = vld [vmem:[%s6342_s0 + $0x138] sm:$0xff]   ;;  %v5211_v43 = vld [vmem:[%s6342_s0 + $0x140] sm:$0xff]   ;;  %v5222_v44 = vld [vmem:[%s6342_s0 + $0x148] sm:$0xff]  }
  0x4f   :  { %4100 = vmatprep.mubr.msk.bf16.mxu0 %vm499_vm1, %v5069_v26  ;;  %v5229_v45 = vld [vmem:[%s6342_s0 + $0x150] sm:$0xff]   ;;  %v5240_v46 = vld [vmem:[%s6342_s0 + $0x158] sm:$0xff]   ;;  %v5247_v47 = vld [vmem:[%s6342_s0 + $0x160] sm:$0xff]  }
  0x50   :  { %3951 = vmatmul.mubr.msk.bf16.gmra.mrb[20].mxu1 %vm499_vm1, %v5003_v18  ;;  %v5256_v48 = vld [vmem:[%s6342_s0 + $0x110] sm:$0xff]   ;;  %v5263_v49 = vld [vmem:[%s6342_s0 + $0x168] sm:$0xff]   ;;  %v5280_v51 = vld [vmem:[%s6342_s0 + $0x178] sm:$0xff]  }
  0x51   :  { %3954 = vmatprep.mubr.msk.bf16.mxu1 %vm499_vm1, %v5014_v19  ;;  %v5270_v50 = vld [vmem:[%s6342_s0 + $0x170] sm:$0xff]   ;;  %v5287_v52 = vld [vmem:[%s6342_s0 + $0x180] sm:$0xff]   ;;  %v5298_v53 = vld [vmem:[%s6342_s0 + $0x188] sm:$0xff]  }
  0x52   :  { %v5305_v54 = vld [vmem:[%s6342_s0 + $0x190] sm:$0xff]   ;;  %v5316_v55 = vld [vmem:[%s6342_s0 + $0x198] sm:$0xff]   ;;  %v5336_v58 = vld [vmem:[%s6342_s0 + $0x1c0] sm:$0xff]  }
  0x53   :  { %v4785_v56 = vld [vmem:[%s6342_s0 + $0x1b0] sm:$0xff]   ;;  %v4786_v57 = vld [vmem:[%s6342_s0 + $0x1b8] sm:$0xff]   ;;  %v5346_v59 = vld [vmem:[%s6342_s0 + $0x1c8] sm:$0xff]  }
  0x54   :  { %v5353_v60 = vld [vmem:[%s6342_s0 + $0x1d0] sm:$0xff]   ;;  %v5364_v61 = vld [vmem:[%s6342_s0 + $0x1d8] sm:$0xff]   ;;  %v5383_v62 = vld [vmem:[%s6342_s0 + $0x1a0] sm:$0xff]  }
  0x55   :  { %v5411_v63 = vld [vmem:[%s6342_s0 + $0x1e0] sm:$0xff]   ;;  %v5418_v0 = vld [vmem:[%s6342_s0 + $0x1e8] sm:$0xff]   ;;  %v5429_v1 = vld [vmem:[%s6342_s0 + $0x1f0] sm:$0xff]  }
  0x56   :  { %4101 = vmatmul.mubr.msk.bf16.gmra.mrb[40].mxu0 %vm499_vm1, %v5080_v27  ;;  %v5436_v2 = vld [vmem:[%s6342_s0 + $0x1f8] sm:$0xff]   ;;  %v5447_v3 = vld [vmem:[%s6342_s0 + $0x200] sm:$0xff]   ;;  %v4792_v15 = vld [vmem:[%s6342_s0 + $0x88] sm:$0xff]  }
  0x57   :  { %4104 = vmatprep.mubr.msk.bf16.mxu0 %vm499_vm1, %v5087_v28  ;;  %v5501_v16 = vld [vmem:[%s6342_s0 + $0x220] sm:$0xff]   ;;  %v5527_v22 = vld [vmem:[%s6342_s0 + $0x230] sm:$0xff]  }
  0x58   :  { %3955 = vmatmul.mubr.msk.bf16.gmra.mrb[24].mxu1 %vm499_vm1, %v5019_v20 }
  0x59   :  { %3958 = vmatprep.mubr.msk.bf16.mxu1 %vm499_vm1, %v5032_v21 }
  0x5e   :  { %4105 = vmatmul.mubr.msk.bf16.gmra.mrb[44].mxu0 %vm499_vm1, %v5098_v29 }
  0x5f   :  { %4108 = vmatprep.mubr.msk.bf16.mxu0 %vm499_vm1, %v5105_v30 }
  0x60   :  { %3959 = vmatmul.mubr.msk.bf16.gmra.mrb[28].mxu1 %vm499_vm1, %v5114_v31 }
  0x61   :  { %3962 = vmatprep.mubr.msk.bf16.mxu1 %vm499_vm1, %v4752_v23 }
  0x66   :  { %4109 = vmatmul.mubr.msk.bf16.gmra.mrb[48].mxu0 %vm499_vm1, %v5121_v32 }
  0x67   :  { %4112 = vmatprep.mubr.msk.bf16.mxu0 %vm499_vm1, %v5128_v33 }
  0x68   :  { %3963 = vmatmul.mubr.msk.bf16.gmra.mrb[32].mxu1 %vm499_vm1, %v5050_v24 }
  0x69   :  { %3966 = vmatprep.mubr.msk.bf16.mxu1 %vm499_vm1, %v5062_v25 }
  0x6e   :  { %4113 = vmatmul.mubr.msk.bf16.gmra.mrb[52].mxu0 %vm499_vm1, %v5138_v34 }
  0x6f   :  { %4116 = vmatprep.mubr.msk.bf16.mxu0 %vm499_vm1, %v5145_v35 }
  0x70   :  { %3967 = vmatmul.mubr.msk.bf16.gmra.mrb[36].mxu1 %vm499_vm1, %v5069_v26 }
  0x71   :  { %3970 = vmatprep.mubr.msk.bf16.mxu1 %vm499_vm1, %v5080_v27 }
  0x76   :  { %4117 = vmatmul.mubr.msk.bf16.gmra.mrb[56].mxu0 %vm499_vm1, %v5156_v36 }
  0x77   :  { %4120 = vmatprep.mubr.msk.bf16.mxu0 %vm499_vm1, %v5163_v37 }
  0x78   :  { %3971 = vmatmul.mubr.msk.bf16.gmra.mrb[40].mxu1 %vm499_vm1, %v5087_v28 }
  0x79   :  { %3974 = vmatprep.mubr.msk.bf16.mxu1 %vm499_vm1, %v5098_v29 }
  0x7e   :  { %4121 = vmatmul.mubr.msk.bf16.gmra.mrb[60].mxu0 %vm499_vm1, %v5174_v38 }
  0x7f   :  { %4124 = vmatprep.mubr.msk.bf16.mxu0 %vm499_vm1, %v4767_v39 }
  0x80   :  { %3975 = vmatmul.mubr.msk.bf16.gmra.mrb[44].mxu1 %vm499_vm1, %v5105_v30 }
  0x81   :  { %3978 = vmatprep.mubr.msk.bf16.mxu1 %vm499_vm1, %v5121_v32 }
  0x86   :  { %4125 = vmatmul.mubr.msk.bf16.gmra.mrb[64].mxu0 %vm499_vm1, %v4768_v40 }
  0x87   :  { %4128 = vmatprep.mubr.msk.bf16.mxu0 %vm499_vm1, %v5194_v41 }
  0x88   :  { %3979 = vmatmul.mubr.msk.bf16.gmra.mrb[48].mxu1 %vm499_vm1, %v5128_v33 }
  0x89   :  { %3982 = vmatprep.mubr.msk.bf16.mxu1 %vm499_vm1, %v5138_v34 }
  0x8e   :  { %4129 = vmatmul.mubr.msk.bf16.gmra.mrb[68].mxu0 %vm499_vm1, %v5204_v42 }
  0x8f   :  { %4132 = vmatprep.mubr.msk.bf16.mxu0 %vm499_vm1, %v5211_v43 }
  0x90   :  { %3983 = vmatmul.mubr.msk.bf16.gmra.mrb[52].mxu1 %vm499_vm1, %v5145_v35 }
  0x91   :  { %3986 = vmatprep.mubr.msk.bf16.mxu1 %vm499_vm1, %v5156_v36 }
  0x96   :  { %4133 = vmatmul.mubr.msk.bf16.gmra.mrb[72].mxu0 %vm499_vm1, %v5222_v44 }
  0x97   :  { %4136 = vmatprep.mubr.msk.bf16.mxu0 %vm499_vm1, %v5229_v45 }
  0x98   :  { %3987 = vmatmul.mubr.msk.bf16.gmra.mrb[56].mxu1 %vm499_vm1, %v5163_v37 }
  0x99   :  { %3990 = vmatprep.mubr.msk.bf16.mxu1 %vm499_vm1, %v5174_v38 }
  0x9e   :  { %4137 = vmatmul.mubr.msk.bf16.gmra.mrb[76].mxu0 %vm499_vm1, %v5240_v46 }
  0x9f   :  { %4140 = vmatprep.mubr.msk.bf16.mxu0 %vm499_vm1, %v5247_v47 }
  0xa0   :  { %3991 = vmatmul.mubr.msk.bf16.gmra.mrb[60].mxu1 %vm499_vm1, %v5256_v48 }
  0xa1   :  { %3994 = vmatprep.mubr.msk.bf16.mxu1 %vm499_vm1, %v4768_v40 }
  0xa6   :  { %4141 = vmatmul.mubr.msk.bf16.gmra.mrb[80].mxu0 %vm499_vm1, %v5263_v49 }
  0xa7   :  { %4144 = vmatprep.mubr.msk.bf16.mxu0 %vm499_vm1, %v5270_v50 }
  0xa8   :  { %3995 = vmatmul.mubr.msk.bf16.gmra.mrb[64].mxu1 %vm499_vm1, %v5194_v41 }
  0xa9   :  { %3998 = vmatprep.mubr.msk.bf16.mxu1 %vm499_vm1, %v5204_v42 }
  0xae   :  { %4145 = vmatmul.mubr.msk.bf16.gmra.mrb[84].mxu0 %vm499_vm1, %v5280_v51 }
  0xaf   :  { %4148 = vmatprep.mubr.msk.bf16.mxu0 %vm499_vm1, %v5287_v52 }
  0xb0   :  { %3999 = vmatmul.mubr.msk.bf16.gmra.mrb[68].mxu1 %vm499_vm1, %v5211_v43 }
  0xb1   :  { %4002 = vmatprep.mubr.msk.bf16.mxu1 %vm499_vm1, %v5222_v44 }
  0xb6   :  { %4149 = vmatmul.mubr.msk.bf16.gmra.mrb[88].mxu0 %vm499_vm1, %v5298_v53 }
  0xb7   :  { %4152 = vmatprep.mubr.msk.bf16.mxu0 %vm499_vm1, %v5305_v54 }
  0xb8   :  { %4003 = vmatmul.mubr.msk.bf16.gmra.mrb[72].mxu1 %vm499_vm1, %v5229_v45 }
  0xb9   :  { %4006 = vmatprep.mubr.msk.bf16.mxu1 %vm499_vm1, %v5240_v46 }
  0xbe   :  { %4153 = vmatmul.mubr.msk.bf16.gmra.mrb[92].mxu0 %vm499_vm1, %v5316_v55 }
  0xbf   :  { %4156 = vmatprep.mubr.msk.bf16.mxu0 %vm499_vm1, %v4785_v56 }
  0xc0   :  { %4007 = vmatmul.mubr.msk.bf16.gmra.mrb[76].mxu1 %vm499_vm1, %v5247_v47 }
  0xc1   :  { %4010 = vmatprep.mubr.msk.bf16.mxu1 %vm499_vm1, %v5263_v49 }
  0xc6   :  { %4157 = vmatmul.mubr.msk.bf16.gmra.mrb[96].mxu0 %vm499_vm1, %v4786_v57 }
  0xc7   :  { %4160 = vmatprep.mubr.msk.bf16.mxu0 %vm499_vm1, %v5336_v58 }
  0xc8   :  { %4011 = vmatmul.mubr.msk.bf16.gmra.mrb[80].mxu1 %vm499_vm1, %v5270_v50 }
  0xc9   :  { %4014 = vmatprep.mubr.msk.bf16.mxu1 %vm499_vm1, %v5280_v51 }
  0xce   :  { %4161 = vmatmul.mubr.msk.bf16.gmra.mrb[100].mxu0 %vm499_vm1, %v5346_v59 }
  0xcf   :  { %4164 = vmatprep.mubr.msk.bf16.mxu0 %vm499_vm1, %v5353_v60 }
  0xd0   :  { %4015 = vmatmul.mubr.msk.bf16.gmra.mrb[84].mxu1 %vm499_vm1, %v5287_v52 }
  0xd1   :  { %4018 = vmatprep.mubr.msk.bf16.mxu1 %vm499_vm1, %v5298_v53 }
  0xd6   :  { %4165 = vmatmul.mubr.msk.bf16.gmra.mrb[104].mxu0 %vm499_vm1, %v5364_v61 }
  0xd7   :  { %4190 = vmatprep.mubr.msk.bf16.mxu0 %vm499_vm1, %v4923_v5  ;;  %v5456_v5 = vld [vmem:[%s6342_s0 + $0x208] sm:$0xff]  }
  0xd8   :  { %4019 = vmatmul.mubr.msk.bf16.gmra.mrb[88].mxu1 %vm499_vm1, %v5305_v54 }
  0xd9   :  { %4022 = vmatprep.mubr.msk.bf16.mxu1 %vm499_vm1, %v5316_v55 }
  0xde   :  { %4191 = vmatmul.mubr.msk.bf16.vlgmr.msra.gmra.mrb[0].mxu0 %vm499_vm1, %v4934_v7  ;;  %v5449_v4 = vpop.f32.mrb[0].mxu1 }
  0xdf   :  { %4194 = vmatprep.mubr.msk.bf16.mxu0 %vm499_vm1, %v4939_v8  ;;  %v5458_v6 = vpop.f32.mrb[1].mxu1 }
  0xe0   :  { %4023 = vmatmul.mubr.msk.bf16.gmra.mrb[92].mxu1 %vm499_vm1, %v5383_v62  ;;  %v5460_v7 = vpop.f32.mrb[2].mxu1 }
  0xe1   :  { %4026 = vmatprep.mubr.msk.bf16.mxu1 %vm499_vm1, %v4786_v57  ;;  %v5462_v8 = vpop.f32.mrb[3].mxu1 }
  0xe6   :  { %4195 = vmatmul.mubr.msk.bf16.gmra.mrb[4].mxu0 %vm499_vm1, %v4948_v9  ;;  %v5473_v9 = vld [vmem:[%s6342_s0 + $0x210] sm:$0xff]  }
  0xe7   :  { %4198 = vmatprep.mubr.msk.bf16.mxu0 %vm499_vm1, %v4953_v10  ;;  %v5475_v10 = vpop.f32.mrb[4].mxu1 }
  0xe8   :  { %4027 = vmatmul.mubr.msk.bf16.gmra.mrb[96].mxu1 %vm499_vm1, %v5336_v58 }
  0xe9   :  { %4030 = vmatprep.mubr.msk.bf16.mxu1 %vm499_vm1, %v5346_v59 }
  0xee   :  { %4199 = vmatmul.mubr.msk.bf16.gmra.mrb[8].mxu0 %vm499_vm1, %v4962_v11  ;;  %v5482_v11 = vld [vmem:[%s6342_s0 + $0x218] sm:$0xff]  }
  0xef   :  { %4202 = vmatprep.mubr.msk.bf16.mxu0 %vm499_vm1, %v4967_v12  ;;  %v5484_v12 = vpop.f32.mrb[5].mxu1 }
  0xf0   :  { %4031 = vmatmul.mubr.msk.bf16.gmra.mrb[100].mxu1 %vm499_vm1, %v5353_v60 }
  0xf1   :  { %4034 = vmatprep.mubr.msk.bf16.mxu1 %vm499_vm1, %v5364_v61 }
  0xf6   :  { %4203 = vmatmul.mubr.msk.bf16.gmra.mrb[12].mxu0 %vm499_vm1, %v4976_v13  ;;  %v5486_v13 = vpop.f32.mrb[6].mxu1 }
  0xf7   :  { %4206 = vmatprep.mubr.msk.bf16.mxu0 %vm499_vm1, %v4981_v14  ;;  %v5488_v14 = vpop.f32.mrb[7].mxu1 }
  0xf8   :  { %4035 = vmatmul.mubr.msk.bf16.gmra.mrb[104].mxu1 %vm499_vm1, %v5411_v63 }
  0xf9   :  { %4038 = vmatprep.mubr.msk.bf16.mxu1 %vm499_vm1, %v5418_v0 }
  0xfe   :  { %4207 = vmatmul.mubr.msk.bf16.gmra.mrb[16].mxu0 %vm499_vm1, %v4996_v17  ;;  %v5503_v17 = vpop.f32.mrb[8].mxu1 }
  0xff   :  { %4210 = vmatprep.mubr.msk.bf16.mxu0 %vm499_vm1, %v5003_v18  ;;  %v5510_v18 = vld [vmem:[%s6342_s0 + $0x228] sm:$0xff]  }
 0x100   :  { %4039 = vmatmul.mubr.msk.bf16.gmra.mrb[108].mxu1 %vm499_vm1, %v5429_v1 }
 0x101   :  { %4042 = vmatprep.mubr.msk.bf16.mxu1 %vm499_vm1, %v5436_v2 }
 0x106   :  { %4211 = vmatmul.mubr.msk.bf16.gmra.mrb[20].mxu0 %vm499_vm1, %v5014_v19  ;;  %v5512_v19 = vpop.f32.mrb[9].mxu1 }
 0x107   :  { %4214 = vmatprep.mubr.msk.bf16.mxu0 %vm499_vm1, %v5019_v20  ;;  %v5514_v20 = vpop.f32.mrb[10].mxu1 }
 0x108   :  { %4043 = vmatmul.mubr.msk.bf16.gmra.mrb[112].mxu1 %vm499_vm1, %v5447_v3 }
 0x109   :  { %4046 = vmatprep.mubr.msk.bf16.mxu1 %vm499_vm1, %v5456_v5 }
 0x10e   :  { %4215 = vmatmul.mubr.msk.bf16.gmra.mrb[24].mxu0 %vm499_vm1, %v5032_v21  ;;  %v5516_v21 = vpop.f32.mrb[11].mxu1 }
 0x10f   :  { %4218 = vmatprep.mubr.msk.bf16.mxu0 %vm499_vm1, %v5114_v31  ;;  %v5529_v23 = vpop.f32.mrb[12].mxu1 }
 0x110   :  { %4047 = vmatmul.mubr.msk.bf16.gmra.mrb[116].mxu1 %vm499_vm1, %v5473_v9 }
 0x111   :  { %4050 = vmatprep.mubr.msk.bf16.mxu1 %vm499_vm1, %v5482_v11 }
 0x116   :  { %4219 = vmatmul.mubr.msk.bf16.gmra.mrb[28].mxu0 %vm499_vm1, %v4792_v15 }
 0x117   :  { %4222 = vmatprep.mubr.msk.bf16.mxu0 %vm499_vm1, %v5050_v24  ;;  %v5533_v24 = vpop.f32.mrb[13].mxu1 }
 0x118   :  { %4051 = vmatmul.mubr.msk.bf16.gmra.mrb[120].mxu1 %vm499_vm1, %v5501_v16  ;;  %v5535_v31 = vpop.f32.mrb[14].mxu1 }
 0x119   :  { %4054 = vmatprep.mubr.msk.bf16.mxu1 %vm499_vm1, %v5510_v18  ;;  %v5537_v39 = vpop.f32.mrb[15].mxu1 }
 0x11e   :  { %4223 = vmatmul.mubr.msk.bf16.gmra.mrb[32].mxu0 %vm499_vm1, %v5062_v25  ;;  %v5545_v25 = vpop.f32.mrb[16].mxu1 }
 0x11f   :  { %4226 = vmatprep.mubr.msk.bf16.mxu0 %vm499_vm1, %v5069_v26  ;;  %v5549_v26 = vpop.f32.mrb[17].mxu1 }
 0x120   :  { %4055 = vmatmul.mubr.msk.bf16.gmra.mrb[124].mxu1 %vm499_vm1, %v5527_v22  ;;  %v5551_v40 = vpop.f32.mrb[18].mxu1 }
 0x121   :  { %4168 = vmatprep.mubr.msk.bf16.mxu1 %vm499_vm1, %v5411_v63  ;;  %v5553_v56 = vpop.f32.mrb[19].mxu1 }
 0x126   :  { %4227 = vmatmul.mubr.msk.bf16.gmra.mrb[36].mxu0 %vm499_vm1, %v5080_v27  ;;  %v5561_v27 = vpop.f32.mrb[20].mxu1 }
 0x127   :  { %4230 = vmatprep.mubr.msk.bf16.mxu0 %vm499_vm1, %v5087_v28  ;;  %v5565_v28 = vpop.f32.mrb[21].mxu1 }
 0x128   :  { %4169 = vmatmul.mubr.msk.bf16.vlgmr.msra.gmra.mrb[108].mxu1 %vm499_vm1, %v5418_v0  ;;  %6351 = vst [vmem:[#allocation8_spill] sm:$0xff] %v5565_v28  ;;  %v5567_v57 = vpop.f32.mrb[22].mxu1 }
 0x129   :  { %4172 = vmatprep.mubr.msk.bf16.mxu1 %vm499_vm1, %v5429_v1  ;;  %6352 = vst [vmem:[#allocation9_spill] sm:$0xff] %v5567_v57  ;;  %v5569_v15 = vpop.f32.mrb[23].mxu1 }
 0x12e   :  { %4231 = vmatmul.mubr.msk.bf16.gmra.mrb[40].mxu0 %vm499_vm1, %v5098_v29  ;;  %v5577_v29 = vpop.f32.mrb[24].mxu1 }
 0x12f   :  { %4234 = vmatprep.mubr.msk.bf16.mxu0 %vm499_vm1, %v5105_v30  ;;  %v5581_v30 = vpop.f32.mrb[25].mxu1 }
 0x130   :  { %4173 = vmatmul.mubr.msk.bf16.gmra.mrb[112].mxu1 %vm499_vm1, %v5436_v2  ;;  %6353 = vst [vmem:[#allocation10_spill] sm:$0xff] %v5581_v30  ;;  %v5583_v28 = vpop.f32.mrb[26].mxu1 }
 0x131   :  { %4176 = vmatprep.mubr.msk.bf16.mxu1 %vm499_vm1, %v5447_v3  ;;  %6354 = vst [vmem:[#allocation11_spill] sm:$0xff] %v5583_v28  ;;  %v5585_v57 = vpop.f32.mrb[27].mxu1 }
 0x136   :  { %4235 = vmatmul.mubr.msk.bf16.gmra.mrb[44].mxu0 %vm499_vm1, %v5121_v32  ;;  %v5593_v32 = vpop.f32.mrb[28].mxu1 }
 0x137   :  { %4238 = vmatprep.mubr.msk.bf16.mxu0 %vm499_vm1, %v5128_v33  ;;  %v5597_v33 = vpop.f32.mrb[29].mxu1 }
 0x138   :  { %4177 = vmatmul.mubr.msk.bf16.gmra.mrb[116].mxu1 %vm499_vm1, %v5456_v5  ;;  %6355 = vst [vmem:[#allocation12_spill] sm:$0xff] %v5597_v33  ;;  %v5599_v30 = vpop.f32.mrb[30].mxu1 }
 0x139   :  { %4180 = vmatprep.mubr.msk.bf16.mxu1 %vm499_vm1, %v5473_v9  ;;  %6356 = vst [vmem:[#allocation13_spill] sm:$0xff] %v5599_v30  ;;  %v5601_v28 = vpop.f32.mrb[31].mxu1 }
 0x13a   :  { %6357 = vst [vmem:[#allocation14_spill] sm:$0xff] %v5601_v28 }
 0x13e   :  { %4239 = vmatmul.mubr.msk.bf16.gmra.mrb[48].mxu0 %vm499_vm1, %v5138_v34  ;;  %v5609_v34 = vpop.f32.mrb[32].mxu1 }
 0x13f   :  { %4242 = vmatprep.mubr.msk.bf16.mxu0 %vm499_vm1, %v5145_v35  ;;  %v5613_v35 = vpop.f32.mrb[33].mxu1 }
 0x140   :  { %4181 = vmatmul.mubr.msk.bf16.gmra.mrb[120].mxu1 %vm499_vm1, %v5482_v11  ;;  %6358 = vst [vmem:[#allocation15_spill] sm:$0xff] %v5613_v35  ;;  %v5615_v33 = vpop.f32.mrb[34].mxu1 }
 0x141   :  { %4184 = vmatprep.mubr.msk.bf16.mxu1 %vm499_vm1, %v5501_v16  ;;  %6359 = vst [vmem:[#allocation16_spill] sm:$0xff] %v5615_v33  ;;  %v5617_v30 = vpop.f32.mrb[35].mxu1 }
 0x142   :  { %6360 = vst [vmem:[#allocation17_spill] sm:$0xff] %v5617_v30  ;;  %v4794_v30 = vld [vmem:[%s6342_s0 + $0x118] sm:$0xff]  }
 0x143   :  { %v5623_v28 = vpop.f32.mrb[36].mxu1 }
 0x146   :  { %4243 = vmatmul.mubr.msk.bf16.gmra.mrb[52].mxu0 %vm499_vm1, %v5156_v36  ;;  %v5627_v36 = vpop.f32.mrb[37].mxu1 }
 0x147   :  { %4246 = vmatprep.mubr.msk.bf16.mxu0 %vm499_vm1, %v5163_v37  ;;  %6361 = vst [vmem:[#allocation18_spill] sm:$0xff] %v5627_v36  ;;  %v5629_v37 = vpop.f32.mrb[38].mxu1 }
 0x148   :  { %4185 = vmatmul.mubr.msk.bf16.gmra.mrb[124].mxu1 %vm499_vm1, %v5510_v18  ;;  %6362 = vst [vmem:[#allocation19_spill] sm:$0xff] %v5629_v37  ;;  %v5631_v35 = vpop.f32.mrb[39].mxu1 }
 0x149   :  { %6363 = vst [vmem:[#allocation20_spill] sm:$0xff] %v5631_v35 }
 0x14b   :  { %v5637_v33 = vpop.f32.mrb[40].mxu1 }
 0x14c   :  { %6364 = vst [vmem:[#allocation21_spill] sm:$0xff] %v5637_v33 }
 0x14e   :  { %4247 = vmatmul.mubr.msk.bf16.gmra.mrb[56].mxu0 %vm499_vm1, %v5174_v38  ;;  %v5641_v38 = vpop.f32.mrb[41].mxu1 }
 0x14f   :  { %4250 = vmatprep.mubr.msk.bf16.mxu0 %vm499_vm1, %v5256_v48  ;;  %v5643_v48 = vpop.f32.mrb[42].mxu1 }
 0x150   :  { %v5645_v36 = vpop.f32.mrb[43].mxu1 }
 0x151   :  { %6365 = vst [vmem:[#allocation22_spill] sm:$0xff] %v5645_v36 }
 0x153   :  { %v5649_v35 = vpop.f32.mrb[44].mxu1 }
 0x154   :  { %6366 = vst [vmem:[#allocation23_spill] sm:$0xff] %v5649_v35 }
 0x156   :  { %4251 = vmatmul.mubr.msk.bf16.gmra.mrb[60].mxu0 %vm499_vm1, %v4794_v30  ;;  %v5653_v30 = vpop.f32.mrb[45].mxu1 }
 0x157   :  { %4254 = vmatprep.mubr.msk.bf16.mxu0 %vm499_vm1, %v5194_v41  ;;  %v5655_v33 = vpop.f32.mrb[46].mxu1 }
 0x158   :  { %v5657_v37 = vpop.f32.mrb[47].mxu1 }
 0x159   :  { %6367 = vst [vmem:[#allocation24_spill] sm:$0xff] %v5657_v37 }
 0x15b   :  { %v5661_v41 = vpop.f32.mrb[48].mxu1 }
 0x15c   :  { %6368 = vst [vmem:[#allocation25_spill] sm:$0xff] %v5661_v41 }
 0x15e   :  { %4255 = vmatmul.mubr.msk.bf16.gmra.mrb[64].mxu0 %vm499_vm1, %v5204_v42  ;;  %v5665_v42 = vpop.f32.mrb[49].mxu1 }
 0x15f   :  { %4258 = vmatprep.mubr.msk.bf16.mxu0 %vm499_vm1, %v5211_v43  ;;  %v5667_v35 = vpop.f32.mrb[50].mxu1 }
 0x160   :  { %v5669_v36 = vpop.f32.mrb[51].mxu1 }
 0x161   :  { %6369 = vst [vmem:[#allocation26_spill] sm:$0xff] %v5669_v36 }
 0x163   :  { %v5673_v43 = vpop.f32.mrb[52].mxu1 }
 0x164   :  { %6370 = vst [vmem:[#allocation27_spill] sm:$0xff] %v5673_v43 }
 0x166   :  { %4259 = vmatmul.mubr.msk.bf16.gmra.mrb[68].mxu0 %vm499_vm1, %v5222_v44  ;;  %v5677_v44 = vpop.f32.mrb[53].mxu1 }
 0x167   :  { %4262 = vmatprep.mubr.msk.bf16.mxu0 %vm499_vm1, %v5229_v45  ;;  %v5679_v41 = vpop.f32.mrb[54].mxu1 }
 0x168   :  { %v5681_v37 = vpop.f32.mrb[55].mxu1 }
 0x169   :  { %6371 = vst [vmem:[#allocation28_spill] sm:$0xff] %v5681_v37 }
 0x16b   :  { %v5685_v45 = vpop.f32.mrb[56].mxu1 }
 0x16c   :  { %6372 = vst [vmem:[#allocation29_spill] sm:$0xff] %v5685_v45 }
 0x16e   :  { %4263 = vmatmul.mubr.msk.bf16.gmra.mrb[72].mxu0 %vm499_vm1, %v5240_v46  ;;  %v5689_v46 = vpop.f32.mrb[57].mxu1 }
 0x16f   :  { %4266 = vmatprep.mubr.msk.bf16.mxu0 %vm499_vm1, %v5247_v47  ;;  %v5691_v43 = vpop.f32.mrb[58].mxu1 }
 0x170   :  { %v5693_v36 = vpop.f32.mrb[59].mxu1 }
 0x171   :  { %6373 = vst [vmem:[#allocation30_spill] sm:$0xff] %v5693_v36 }
 0x173   :  { %v5697_v47 = vpop.f32.mrb[60].mxu1 }
 0x174   :  { %6374 = vst [vmem:[#allocation31_spill] sm:$0xff] %v5697_v47 }
 0x176   :  { %4267 = vmatmul.mubr.msk.bf16.gmra.mrb[76].mxu0 %vm499_vm1, %v5263_v49  ;;  %v5701_v49 = vpop.f32.mrb[61].mxu1 }
 0x177   :  { %4270 = vmatprep.mubr.msk.bf16.mxu0 %vm499_vm1, %v5270_v50  ;;  %6375 = vst [vmem:[#allocation32_spill] sm:$0xff] %v5701_v49  ;;  %v5703_v45 = vpop.f32.mrb[62].mxu1 }
 0x178   :  { %6376 = vst [vmem:[#allocation33_spill] sm:$0xff] %v5703_v45  ;;  %v5705_v37 = vpop.f32.mrb[63].mxu1 }
 0x179   :  { %6377 = vst [vmem:[#allocation34_spill] sm:$0xff] %v5705_v37 }
 0x17b   :  { %v5709_v50 = vpop.f32.mrb[64].mxu1 }
 0x17c   :  { %6378 = vst [vmem:[#allocation35_spill] sm:$0xff] %v5709_v50 }
 0x17e   :  { %4271 = vmatmul.mubr.msk.bf16.gmra.mrb[80].mxu0 %vm499_vm1, %v5280_v51  ;;  %v5713_v51 = vpop.f32.mrb[65].mxu1 }
 0x17f   :  { %4274 = vmatprep.mubr.msk.bf16.mxu0 %vm499_vm1, %v5287_v52  ;;  %6379 = vst [vmem:[#allocation36_spill] sm:$0xff] %v5713_v51  ;;  %v5715_v47 = vpop.f32.mrb[66].mxu1 }
 0x180   :  { %6380 = vst [vmem:[#allocation37_spill] sm:$0xff] %v5715_v47  ;;  %v5717_v36 = vpop.f32.mrb[67].mxu1  ;;  %v2805_v47 = vlaneseq }
 0x181   :  { %6381 = vst [vmem:[#allocation38_spill] sm:$0xff] %v5717_v36 }
 0x182   :  { %v2815_v36 = vshrl.u32 %v2805_v47, 7 }
 0x183   :  { %v5721_v52 = vpop.f32.mrb[68].mxu1 }
 0x184   :  { %6382 = vst [vmem:[#allocation39_spill] sm:$0xff] %v5721_v52  ;;  %v5748_v45 = vmul.u32 256, %v2815_v36 }
 0x186   :  { %4275 = vmatmul.mubr.msk.bf16.gmra.mrb[84].mxu0 %vm499_vm1, %v5298_v53  ;;  %v5725_v53 = vpop.f32.mrb[69].mxu1 }
 0x187   :  { %4278 = vmatprep.mubr.msk.bf16.mxu0 %vm499_vm1, %v5305_v54  ;;  %6383 = vst [vmem:[#allocation40_spill] sm:$0xff] %v5725_v53  ;;  %v5727_v50 = vpop.f32.mrb[70].mxu1  ;;  %v4806_v54 = vld [vmem:[%s6342_s0 + $0x1a8] sm:$0xff]   ;;  %v5741_v53 = vand.u32 127, %v2805_v47 }
 0x188   :  { %6384 = vst [vmem:[#allocation41_spill] sm:$0xff] %v5727_v50  ;;  %v5729_v37 = vpop.f32.mrb[71].mxu1  ;;  %v2825_v50 = vadd.s32 1, %v2815_v36 }
 0x189   :  { %6385 = vst [vmem:[#allocation42_spill] sm:$0xff] %v5729_v37  ;;  %v2807_v51 = vadd.s32 128, %v5741_v53  ;;  %vm2817_vm5 = vcmp.ge.s32.totalorder %v5741_v53, %v5748_v45 }
 0x18a   :  { %v5750_v49 = vmul.u32 256, %v2825_v50 }
 0x18b   :  { %vm2818_vm2 = vcmp.ge.s32.totalorder %v2807_v51, %v5748_v45 }
 0x18c   :  { %vm2828_vm3 = vcmp.lt.s32.totalorder %v2807_v51, %v5750_v49  ;;  %vm2827_vm6 = vcmp.lt.s32.totalorder %v5741_v53, %v5750_v49 }
 0x18d   :  { %vm2836_vm4 = vmand %vm2818_vm2, %vm2828_vm3 }
 0x18e   :  { %4279 = vmatmul.mubr.msk.bf16.gmra.mrb[88].mxu0 %vm499_vm1, %v5316_v55  ;;  %v5735_v55 = vpop.f32.mrb[72].mxu1  ;;  %vm2835_vm9 = vmand %vm2817_vm5, %vm2827_vm6 }
 0x18f   :  { %4282 = vmatprep.mubr.msk.bf16.mxu0 %vm499_vm1, %v5383_v62  ;;  %v5739_v62 = vpop.f32.mrb[73].mxu1 }
 0x190   :  { %v5743_v52 = vpop.f32.mrb[74].mxu1 }
 0x191   :  { %v5745_v37 = vpop.f32.mrb[75].mxu1 }
 0x192   :  { %6386 = vst [vmem:[#allocation43_spill] sm:$0xff] %v5745_v37 }
 0x193   :  { %v5757_v47 = vpop.f32.mrb[76].mxu1 }
 0x194   :  { %6387 = vst [vmem:[#allocation44_spill] sm:$0xff] %v5757_v47  ;;  %v5761_v36 = vpop.f32.mrb[77].mxu1 }
 0x195   :  { %6388 = vst [vmem:[#allocation45_spill] sm:$0xff] %v5761_v36  ;;  %v5763_v50 = vpop.f32.mrb[78].mxu1 }
 0x196   :  { %4283 = vmatmul.mubr.msk.bf16.gmra.mrb[92].mxu0 %vm499_vm1, %v4806_v54  ;;  %6389 = vst [vmem:[#allocation46_spill] sm:$0xff] %v5763_v50  ;;  %v5765_v54 = vpop.f32.mrb[79].mxu1 }
 0x197   :  { %4286 = vmatprep.mubr.msk.bf16.mxu0 %vm499_vm1, %v5336_v58  ;;  %v6349_v58 = vmov 0.00390625   ;;  %6390 = vst [vmem:[#allocation47_spill] sm:$0xff] %v5765_v54 }
 0x198   :  { %3566 = vmatprep.mubr.msk.f32.mxu1 %vm2836_vm4, %v6349_v58 }
 0x19b   :  { %v5769_v51 = vpop.f32.mrb[80].mxu1 }
 0x19c   :  { %6391 = vst [vmem:[#allocation48_spill] sm:$0xff] %v5769_v51 }
 0x19e   :  { %4287 = vmatmul.mubr.msk.bf16.gmra.mrb[96].mxu0 %vm499_vm1, %v5346_v59  ;;  %v5773_v59 = vpop.f32.mrb[81].mxu1 }
 0x19f   :  { %4290 = vmatprep.mubr.msk.bf16.mxu0 %vm499_vm1, %v5353_v60  ;;  %6392 = vst [vmem:[#allocation49_spill] sm:$0xff] %v5773_v59  ;;  %v5775_v58 = vpop.f32.mrb[82].mxu1 }
 0x1a0   :  { %6393 = vst [vmem:[#allocation50_spill] sm:$0xff] %v5775_v58  ;;  %v5777_v47 = vpop.f32.mrb[83].mxu1 }
 0x1a1   :  { %6394 = vst [vmem:[#allocation51_spill] sm:$0xff] %v5777_v47 }
 0x1a3   :  { %v5781_v60 = vpop.f32.mrb[84].mxu1 }
 0x1a4   :  { %6395 = vst [vmem:[#allocation52_spill] sm:$0xff] %v5781_v60 }
 0x1a6   :  { %4291 = vmatmul.mubr.msk.bf16.gmra.mrb[100].mxu0 %vm499_vm1, %v5364_v61  ;;  %v5785_v61 = vpop.f32.mrb[85].mxu1 }
 0x1a7   :  { %4294 = vmatprep.mubr.msk.bf16.mxu0 %vm499_vm1, %v5411_v63  ;;  %6396 = vst [vmem:[#allocation53_spill] sm:$0xff] %v5785_v61  ;;  %v5787_v51 = vpop.f32.mrb[86].mxu1  ;;  %v5792_v63 = vld [vmem:[%s6344_s2] ss:$0 sm:$0xff] }
 0x1a8   :  { %6397 = vst [vmem:[#allocation54_spill] sm:$0xff] %v5787_v51  ;;  %v5794_v58 = vpop.f32.mrb[87].mxu1 }
 0x1a9   :  { %6398 = vst [vmem:[#allocation55_spill] sm:$0xff] %v5794_v58 }
 0x1ab   :  { %v5805_v58 = vpop.f32.mrb[88].mxu1 }
 0x1ac   :  { %6399 = vst [vmem:[#allocation56_spill] sm:$0xff] %v5805_v58 }
 0x1ae   :  { %4295 = vmatmul.mubr.msk.bf16.gmra.mrb[104].mxu0 %vm499_vm1, %v5418_v0 }
 0x1af   :  { %4298 = vmatprep.mubr.msk.bf16.mxu0 %vm499_vm1, %v5429_v1 }
 0x1b1   :  { %v4192_v54 = vpop.f32.mrb[0].mxu0 }
 0x1b2   :  { %v4468_v47 = vadd.f32 %v4192_v54, %v5449_v4  ;;  %v1903_v0 = vpop.f32.mrb[1].mxu0 }
 0x1b3   :  { %v4469_v60 = vadd.f32 %v1903_v0, %v5458_v6  ;;  %v4193_v59 = vpop.f32.mrb[2].mxu0  ;;  %v5810_v6 = vpop.f32.mrb[89].mxu1 }
 0x1b4   :  { %v2551_v1 = vadd.f32 %v4468_v47, %v5792_v63  ;;  %v4470_v61 = vadd.f32 %v4193_v59, %v5460_v7  ;;  %v1906_v50 = vpop.f32.mrb[3].mxu0  ;;  %v5812_v54 = vpop.f32.mrb[90].mxu1 }
 0x1b5   :  { %v2549_v51 = vadd.f32 %v4469_v60, %v5792_v63  ;;  %v4471_v36 = vadd.f32 %v1906_v50, %v5462_v8  ;;  %6400 = vst [vmem:[#allocation57_spill] sm:$0xff] %v5812_v54  ;;  %v5814_v60 = vpop.f32.mrb[91].mxu1 }
 0x1b6   :  { %v2552_v37 = vadd.f32 %v4470_v61, %v5792_v63  ;;  %4299 = vmatmul.mubr.msk.bf16.gmra.mrb[108].mxu0 %vm499_vm1, %v5436_v2  ;;  %v2679_v7 = vmax.f32 %v2551_v1, 0.0 }
 0x1b7   :  { %v2550_v4 = vadd.f32 %v4471_v36, %v5792_v63  ;;  %4302 = vmatprep.mubr.msk.bf16.mxu0 %vm499_vm1, %v5447_v3  ;;  %v2677_v59 = vmax.f32 %v2549_v51, 0.0 }
 0x1b8   :  { %v2680_v47 = vmax.f32 %v2552_v37, 0.0 }
 0x1b9   :  { %v2678_v8 = vmax.f32 %v2550_v4, 0.0  ;;  %v4196_v50 = vpop.f32.mrb[4].mxu0 }
 0x1ba   :  { %v5816_v61 = vpack.c.bf16 %v2680_v47, %v2679_v7  ;;  %v4472_v2 = vadd.f32 %v4196_v50, %v5475_v10  ;;  %v1919_v0 = vpop.f32.mrb[5].mxu0  ;;  %v5829_v10 = vpop.f32.mrb[92].mxu1 }
 0x1bb   :  { %v5819_v36 = vpack.c.bf16 %v2678_v8, %v2677_v59  ;;  %v4473_v3 = vadd.f32 %v1919_v0, %v5484_v12  ;;  %v4197_v58 = vpop.f32.mrb[6].mxu0  ;;  %v5834_v12 = vpop.f32.mrb[93].mxu1 }
 0x1bc   :  { %v2555_v1 = vadd.f32 %v4472_v2, %v5792_v63  ;;  %v4474_v37 = vadd.f32 %v4197_v58, %v5486_v13  ;;  %v1922_v54 = vpop.f32.mrb[7].mxu0  ;;  %v5836_v59 = vpop.f32.mrb[94].mxu1 }
 0x1bd   :  { %v2553_v51 = vadd.f32 %v4473_v3, %v5792_v63  ;;  %v4475_v4 = vadd.f32 %v1922_v54, %v5488_v14  ;;  %v5838_v50 = vpop.f32.mrb[95].mxu1 }
 0x1be   :  { %v2556_v7 = vadd.f32 %v4474_v37, %v5792_v63  ;;  %4303 = vmatmul.mubr.msk.bf16.gmra.mrb[112].mxu0 %vm499_vm1, %v5456_v5  ;;  %v2683_v13 = vmax.f32 %v2555_v1, 0.0 }
 0x1bf   :  { %v2554_v47 = vadd.f32 %v4475_v4, %v5792_v63  ;;  %4306 = vmatprep.mubr.msk.bf16.mxu0 %vm499_vm1, %v5473_v9  ;;  %v2681_v8 = vmax.f32 %v2553_v51, 0.0 }
 0x1c0   :  { %v2684_v58 = vmax.f32 %v2556_v7, 0.0 }
 0x1c1   :  { %v2682_v14 = vmax.f32 %v2554_v47, 0.0  ;;  %v4200_v54 = vpop.f32.mrb[8].mxu0 }
 0x1c2   :  { %v5840_v2 = vpack.c.bf16 %v2684_v58, %v2683_v13  ;;  %v4476_v5 = vadd.f32 %v4200_v54, %v5503_v17  ;;  %v1935_v0 = vpop.f32.mrb[9].mxu0  ;;  %v5853_v17 = vpop.f32.mrb[96].mxu1 }
 0x1c3   :  { %v5843_v3 = vpack.c.bf16 %v2682_v14, %v2681_v8  ;;  %v4477_v9 = vadd.f32 %v1935_v0, %v5512_v19  ;;  %v4201_v37 = vpop.f32.mrb[10].mxu0  ;;  %v5858_v19 = vpop.f32.mrb[97].mxu1 }
 0x1c4   :  { %v2559_v1 = vadd.f32 %v4476_v5, %v5792_v63  ;;  %v4478_v4 = vadd.f32 %v4201_v37, %v5514_v20  ;;  %v1938_v7 = vpop.f32.mrb[11].mxu0  ;;  %v5860_v14 = vpop.f32.mrb[98].mxu1 }
 0x1c5   :  { %v2557_v51 = vadd.f32 %v4477_v9, %v5792_v63  ;;  %v4479_v47 = vadd.f32 %v1938_v7, %v5516_v21  ;;  %v5862_v0 = vpop.f32.mrb[99].mxu1 }
 0x1c6   :  { %v2560_v13 = vadd.f32 %v4478_v4, %v5792_v63  ;;  %4307 = vmatmul.mubr.msk.bf16.gmra.mrb[116].mxu0 %vm499_vm1, %v5482_v11  ;;  %v2687_v20 = vmax.f32 %v2559_v1, 0.0 }
 0x1c7   :  { %v2558_v58 = vadd.f32 %v4479_v47, %v5792_v63  ;;  %4310 = vmatprep.mubr.msk.bf16.mxu0 %vm499_vm1, %v5501_v16  ;;  %v2685_v54 = vmax.f32 %v2557_v51, 0.0 }
 0x1c8   :  { %v2688_v8 = vmax.f32 %v2560_v13, 0.0 }
 0x1c9   :  { %v2686_v21 = vmax.f32 %v2558_v58, 0.0  ;;  %v4204_v5 = vpop.f32.mrb[12].mxu0 }
 0x1ca   :  { %v5864_v9 = vpack.c.bf16 %v2688_v8, %v2687_v20  ;;  %v4480_v11 = vadd.f32 %v4204_v5, %v5529_v23  ;;  %v1951_v37 = vpop.f32.mrb[13].mxu0  ;;  %v5877_v23 = vpop.f32.mrb[100].mxu1 }
 0x1cb   :  { %v5867_v4 = vpack.c.bf16 %v2686_v21, %v2685_v54  ;;  %v4481_v16 = vadd.f32 %v1951_v37, %v5533_v24  ;;  %v4205_v7 = vpop.f32.mrb[14].mxu0  ;;  %v5882_v24 = vpop.f32.mrb[101].mxu1 }
 0x1cc   :  { %v2563_v1 = vadd.f32 %v4480_v11, %v5792_v63  ;;  %v4482_v47 = vadd.f32 %v4205_v7, %v5535_v31  ;;  %v1954_v13 = vpop.f32.mrb[15].mxu0  ;;  %v5884_v21 = vpop.f32.mrb[102].mxu1 }
 0x1cd   :  { %v2561_v51 = vadd.f32 %v4481_v16, %v5792_v63  ;;  %v4483_v58 = vadd.f32 %v1954_v13, %v5537_v39  ;;  %6401 = vst [vmem:[#allocation58_spill] sm:$0xff] %v5884_v21  ;;  %v5886_v37 = vpop.f32.mrb[103].mxu1 }
 0x1ce   :  { %v2564_v20 = vadd.f32 %v4482_v47, %v5792_v63  ;;  %4311 = vmatmul.mubr.msk.bf16.gmra.mrb[120].mxu0 %vm499_vm1, %v5510_v18  ;;  %v2691_v31 = vmax.f32 %v2563_v1, 0.0  ;;  %6402 = vst [vmem:[#allocation59_spill] sm:$0xff] %v5886_v37 }
 0x1cf   :  { %v2562_v8 = vadd.f32 %v4483_v58, %v5792_v63  ;;  %4314 = vmatprep.mubr.msk.bf16.mxu0 %vm499_vm1, %v5527_v22  ;;  %v2689_v5 = vmax.f32 %v2561_v51, 0.0  ;;  %v4807_v22 = vld [vmem:[%s6342_s0 + $0x238] sm:$0xff]  }
 0x1d0   :  { %v2692_v54 = vmax.f32 %v2564_v20, 0.0 }
 0x1d1   :  { %v2690_v39 = vmax.f32 %v2562_v8, 0.0  ;;  %v4208_v11 = vpop.f32.mrb[16].mxu0 }
 0x1d2   :  { %v5888_v16 = vpack.c.bf16 %v2692_v54, %v2691_v31  ;;  %v4484_v18 = vadd.f32 %v4208_v11, %v5545_v25  ;;  %v1967_v7 = vpop.f32.mrb[17].mxu0  ;;  %v5903_v54 = vpop.f32.mrb[104].mxu1 }
 0x1d3   :  { %v5894_v47 = vpack.c.bf16 %v2690_v39, %v2689_v5  ;;  %v4485_v1 = vadd.f32 %v1967_v7, %v5549_v26  ;;  %v4209_v13 = vpop.f32.mrb[18].mxu0  ;;  %6403 = vst [vmem:[#allocation60_spill] sm:$0xff] %v5903_v54  ;;  %v5906_v39 = vpop.f32.mrb[105].mxu1 }
 0x1d4   :  { %v2567_v51 = vadd.f32 %v4484_v18, %v5792_v63  ;;  %v4486_v58 = vadd.f32 %v4209_v13, %v5551_v40  ;;  %v1970_v20 = vpop.f32.mrb[19].mxu0  ;;  %6404 = vst [vmem:[#allocation61_spill] sm:$0xff] %v5906_v39  ;;  %v5908_v18 = vpop.f32.mrb[106].mxu1  ;;  %v6407_v39 = vld [vmem:[#allocation9_spill] sm:$0xff] }
 0x1d5   :  { %v2565_v8 = vadd.f32 %v4485_v1, %v5792_v63  ;;  %v4487_v31 = vadd.f32 %v1970_v20, %v5553_v56  ;;  %6405 = vst [vmem:[#allocation62_spill] sm:$0xff] %v5908_v18  ;;  %v5910_v1 = vpop.f32.mrb[107].mxu1 }
 0x1d6   :  { %v2568_v25 = vadd.f32 %v4486_v58, %v5792_v63  ;;  %4315 = vmatmul.mubr.msk.bf16.gmra.mrb[124].mxu0 %vm499_vm1, %v4807_v22  ;;  %v2695_v26 = vmax.f32 %v2567_v51, 0.0  ;;  %v6406_v22 = vld [vmem:[#allocation8_spill] sm:$0xff] }
 0x1d7   :  { %v2566_v5 = vadd.f32 %v4487_v31, %v5792_v63  ;;  %v2693_v40 = vmax.f32 %v2565_v8, 0.0 }
 0x1d8   :  { %v2696_v11 = vmax.f32 %v2568_v25, 0.0 }
 0x1d9   :  { %v2694_v7 = vmax.f32 %v2566_v5, 0.0  ;;  %v4212_v13 = vpop.f32.mrb[20].mxu0 }
 0x1da   :  { %v4488_v56 = vadd.f32 %v4212_v13, %v5561_v27  ;;  %v1983_v58 = vpop.f32.mrb[21].mxu0  ;;  %v4342_v20 = vpack.c.bf16 %v2696_v11, %v2695_v26 }
 0x1db   :  { %v4489_v37 = vadd.f32 %v1983_v58, %v6406_v22  ;;  %v4213_v54 = vpop.f32.mrb[22].mxu0  ;;  %v4338_v21 = vpack.c.bf16 %v2694_v7, %v2693_v40  ;;  %v6409_v22 = vld [vmem:[#allocation11_spill] sm:$0xff] }
 0x1dc   :  { %v2571_v31 = vadd.f32 %v4488_v56, %v5792_v63  ;;  %v4490_v51 = vadd.f32 %v4213_v54, %v6407_v39  ;;  %v1986_v25 = vpop.f32.mrb[23].mxu0 }
 0x1dd   :  { %v2569_v18 = vadd.f32 %v4489_v37, %v5792_v63  ;;  %v4491_v8 = vadd.f32 %v1986_v25, %v5569_v15  ;;  %4339 = vmatprep.subr.bf16.mxu1 %v4338_v21  ;;  %v6408_v15 = vld [vmem:[#allocation10_spill] sm:$0xff] }
 0x1de   :  { %v2572_v5 = vadd.f32 %v4490_v51, %v5792_v63  ;;  %4341 = vmatpush3.bf16.msra.mxu1 %v5819_v36  ;;  %v2699_v26 = vmax.f32 %v2571_v31, 0.0 }
 0x1df   :  { %v2570_v27 = vadd.f32 %v4491_v8, %v5792_v63  ;;  %4343 = vmatprep.subr.bf16.mxu1 %v4342_v20  ;;  %v2697_v40 = vmax.f32 %v2569_v18, 0.0 }
 0x1e0   :  { %v2700_v11 = vmax.f32 %v2572_v5, 0.0 }
 0x1e1   :  { %v2698_v7 = vmax.f32 %v2570_v27, 0.0  ;;  %v4216_v13 = vpop.f32.mrb[24].mxu0 }
 0x1e2   :  { %v4492_v54 = vadd.f32 %v4216_v13, %v5577_v29  ;;  %v1999_v39 = vpop.f32.mrb[25].mxu0  ;;  %4345 = vmatpush3.bf16.msra.mxu1 %v5816_v61  ;;  %v4350_v37 = vpack.c.bf16 %v2700_v11, %v2699_v26 }
 0x1e3   :  { %v4493_v21 = vadd.f32 %v1999_v39, %v6408_v15  ;;  %v4217_v56 = vpop.f32.mrb[26].mxu0  ;;  %v4346_v58 = vpack.c.bf16 %v2698_v7, %v2697_v40  ;;  %v6411_v15 = vld [vmem:[#allocation13_spill] sm:$0xff] }
 0x1e4   :  { %v2575_v36 = vadd.f32 %v4492_v54, %v5792_v63  ;;  %v4494_v51 = vadd.f32 %v4217_v56, %v6409_v22  ;;  %v2002_v20 = vpop.f32.mrb[27].mxu0 }
 0x1e5   :  { %v2573_v31 = vadd.f32 %v4493_v21, %v5792_v63  ;;  %v4495_v18 = vadd.f32 %v2002_v20, %v5585_v57  ;;  %4347 = vmatprep.subr.bf16.mxu1 %v4346_v58  ;;  %v6410_v57 = vld [vmem:[#allocation12_spill] sm:$0xff]  ;;  %v6412_v58 = vld [vmem:[#allocation14_spill] sm:$0xff] }
 0x1e6   :  { %v2576_v29 = vadd.f32 %v4494_v51, %v5792_v63  ;;  %4349 = vmatpush3.bf16.msra.mxu1 %v5843_v3  ;;  %v2703_v25 = vmax.f32 %v2575_v36, 0.0 }
 0x1e7   :  { %v2574_v61 = vadd.f32 %v4495_v18, %v5792_v63  ;;  %4351 = vmatprep.subr.bf16.mxu1 %v4350_v37  ;;  %v2701_v5 = vmax.f32 %v2573_v31, 0.0 }
 0x1e8   :  { %v2704_v8 = vmax.f32 %v2576_v29, 0.0 }
 0x1e9   :  { %v2702_v27 = vmax.f32 %v2574_v61, 0.0  ;;  %v4220_v26 = vpop.f32.mrb[28].mxu0 }
 0x1ea   :  { %v4496_v11 = vadd.f32 %v4220_v26, %v5593_v32  ;;  %v2015_v40 = vpop.f32.mrb[29].mxu0  ;;  %4353 = vmatpush3.bf16.msra.mxu1 %v5840_v2  ;;  %v4358_v7 = vpack.c.bf16 %v2704_v8, %v2703_v25  ;;  %v6413_v8 = vld [vmem:[#allocation15_spill] sm:$0xff] }
 0x1eb   :  { %v4497_v13 = vadd.f32 %v2015_v40, %v6410_v57  ;;  %v4221_v54 = vpop.f32.mrb[30].mxu0  ;;  %v4354_v39 = vpack.c.bf16 %v2702_v27, %v2701_v5  ;;  %v2809_v57 = vadd.s32 384, %v5741_v53 }
 0x1ec   :  { %v2579_v3 = vadd.f32 %v4496_v11, %v5792_v63  ;;  %v4498_v21 = vadd.f32 %v4221_v54, %v6411_v15  ;;  %v2018_v37 = vpop.f32.mrb[31].mxu0  ;;  %v6414_v11 = vld [vmem:[#allocation16_spill] sm:$0xff]  ;;  %v6415_v54 = vld [vmem:[#allocation17_spill] sm:$0xff] }
 0x1ed   :  { %v2577_v56 = vadd.f32 %v4497_v13, %v5792_v63  ;;  %v4499_v36 = vadd.f32 %v2018_v37, %v6412_v58  ;;  %4355 = vmatprep.subr.bf16.mxu1 %v4354_v39  ;;  %vm2820_vm7 = vcmp.ge.s32.totalorder %v2809_v57, %v5748_v45  ;;  %vm2830_vm8 = vcmp.lt.s32.totalorder %v2809_v57, %v5750_v49 }
 0x1ee   :  { %v2580_v32 = vadd.f32 %v4498_v21, %v5792_v63  ;;  %4357 = vmatpush3.bf16.msra.mxu1 %v5867_v4  ;;  %v2707_v22 = vmax.f32 %v2579_v3, 0.0  ;;  %vm2838_vm10 = vmand %vm2820_vm7, %vm2830_vm8 }
 0x1ef   :  { %v2578_v2 = vadd.f32 %v4499_v36, %v5792_v63  ;;  %4359 = vmatprep.subr.bf16.mxu1 %v4358_v7  ;;  %v2705_v20 = vmax.f32 %v2577_v56, 0.0 }
 0x1f0   :  { %v2708_v51 = vmax.f32 %v2580_v32, 0.0 }
 0x1f1   :  { %v2706_v31 = vmax.f32 %v2578_v2, 0.0  ;;  %v4224_v18 = vpop.f32.mrb[32].mxu0  ;;  %v6416_v2 = vld [vmem:[#allocation18_spill] sm:$0xff] }
 0x1f2   :  { %v4500_v29 = vadd.f32 %v4224_v18, %v5609_v34  ;;  %v2031_v61 = vpop.f32.mrb[33].mxu0  ;;  %4361 = vmatpush3.bf16.msra.mxu1 %v5864_v9  ;;  %v4366_v25 = vpack.c.bf16 %v2708_v51, %v2707_v22 }
 0x1f3   :  { %v4501_v5 = vadd.f32 %v2031_v61, %v6413_v8  ;;  %v4225_v27 = vpop.f32.mrb[34].mxu0  ;;  %v4362_v26 = vpack.c.bf16 %v2706_v31, %v2705_v20  ;;  %v6417_v31 = vld [vmem:[#allocation19_spill] sm:$0xff] }
 0x1f4   :  { %v2583_v4 = vadd.f32 %v4500_v29, %v5792_v63  ;;  %v4502_v40 = vadd.f32 %v4225_v27, %v6414_v11  ;;  %v2034_v7 = vpop.f32.mrb[35].mxu0 }
 0x1f5   :  { %v2581_v13 = vadd.f32 %v4501_v5, %v5792_v63  ;;  %v4503_v39 = vadd.f32 %v2034_v7, %v6415_v54  ;;  %4363 = vmatprep.subr.bf16.mxu1 %v4362_v26 }
 0x1f6   :  { %v2584_v34 = vadd.f32 %v4502_v40, %v5792_v63  ;;  %4365 = vmatpush3.bf16.msra.mxu1 %v5894_v47  ;;  %v2711_v3 = vmax.f32 %v2583_v4, 0.0 }
 0x1f7   :  { %v2582_v9 = vadd.f32 %v4503_v39, %v5792_v63  ;;  %4367 = vmatprep.subr.bf16.mxu1 %v4366_v25  ;;  %v2709_v21 = vmax.f32 %v2581_v13, 0.0  ;;  %v6418_v25 = vld [vmem:[#allocation20_spill] sm:$0xff] }
 0x1f8   :  { %v2712_v15 = vmax.f32 %v2584_v34, 0.0  ;;  %v6420_v34 = vld [vmem:[#allocation21_spill] sm:$0xff] }
 0x1f9   :  { %v2710_v37 = vmax.f32 %v2582_v9, 0.0  ;;  %v4228_v56 = vpop.f32.mrb[36].mxu0 }
 0x1fa   :  { %v5958_v58 = vpack.c.bf16 %v2712_v15, %v2711_v3  ;;  %v4504_v47 = vadd.f32 %v4228_v56, %v5623_v28  ;;  %v2047_v36 = vpop.f32.mrb[37].mxu0  ;;  %4369 = vmatpush3.bf16.msra.mxu1 %v5888_v16  ;;  %v6419_v28 = vmov 0.00390625  }
 0x1fb   :  { %v5962_v32 = vpack.c.bf16 %v2710_v37, %v2709_v21  ;;  %v4505_v22 = vadd.f32 %v2047_v36, %v6416_v2  ;;  %v4229_v51 = vpop.f32.mrb[38].mxu0  ;;  %v5970_v5 = vpop.f32.mrb[108].mxu1 }
 0x1fc   :  { %v2587_v20 = vadd.f32 %v4504_v47, %v5792_v63  ;;  %v4506_v18 = vadd.f32 %v4229_v51, %v6417_v31  ;;  %v2050_v29 = vpop.f32.mrb[39].mxu0  ;;  %v5974_v27 = vpop.f32.mrb[109].mxu1 }
 0x1fd   :  { %v2585_v61 = vadd.f32 %v4505_v22, %v5792_v63  ;;  %v4507_v8 = vadd.f32 %v2050_v29, %v6418_v25  ;;  %3567 = vmatmul.mubr.msk.f32.vlgmr.msra.gmra.mrb[128].mxu1 %vm2835_vm9, %v6419_v28  ;;  %v5977_v4 = vpop.f32.mrb[110].mxu1  ;;  %v6421_v22 = vld [vmem:[#allocation22_spill] sm:$0xff] }
 0x1fe   :  { %v2588_v16 = vadd.f32 %v4506_v18, %v5792_v63  ;;  %3568 = vmatprep.mubr.msk.f32.mxu1 %vm2838_vm10, %v6419_v28  ;;  %v2715_v11 = vmax.f32 %v2587_v20, 0.0  ;;  %v5979_v7 = vpop.f32.mrb[111].mxu1  ;;  %vm3197_vm10 = vcmask 261120  }
 0x1ff   :  { %v2586_v26 = vadd.f32 %v4507_v8, %v5792_v63  ;;  %v2713_v57 = vmax.f32 %v2585_v61, 0.0 }
 0x200   :  { %v2716_v40 = vmax.f32 %v2588_v16, 0.0 }
 0x201   :  { %v2714_v13 = vmax.f32 %v2586_v26, 0.0  ;;  %v4232_v54 = vpop.f32.mrb[40].mxu0 }
 0x202   :  { %v5981_v39 = vpack.c.bf16 %v2716_v40, %v2715_v11  ;;  %v4508_v9 = vadd.f32 %v4232_v54, %v6420_v34  ;;  %v2063_v3 = vpop.f32.mrb[41].mxu0  ;;  %v6422_v40 = vld [vmem:[#allocation23_spill] sm:$0xff] }
 0x203   :  { %v5984_v15 = vpack.c.bf16 %v2714_v13, %v2713_v57  ;;  %v4509_v21 = vadd.f32 %v2063_v3, %v5641_v38  ;;  %v4233_v37 = vpop.f32.mrb[42].mxu0  ;;  %v5991_v20 = vpop.f32.mrb[112].mxu1 }
 0x204   :  { %v2591_v56 = vadd.f32 %v4508_v9, %v5792_v63  ;;  %v4510_v47 = vadd.f32 %v4233_v37, %v5643_v48  ;;  %v2066_v36 = vpop.f32.mrb[43].mxu0  ;;  %v5994_v18 = vpop.f32.mrb[113].mxu1 }
 0x205   :  { %v2589_v2 = vadd.f32 %v4509_v21, %v5792_v63  ;;  %v4511_v51 = vadd.f32 %v2066_v36, %v6421_v22  ;;  %v5997_v61 = vpop.f32.mrb[114].mxu1 }
 0x206   :  { %v2592_v31 = vadd.f32 %v4510_v47, %v5792_v63  ;;  %v2719_v38 = vmax.f32 %v2591_v56, 0.0  ;;  %v5999_v8 = vpop.f32.mrb[115].mxu1  ;;  %v6423_v47 = vld [vmem:[#allocation24_spill] sm:$0xff] }
 0x207   :  { %v2590_v29 = vadd.f32 %v4511_v51, %v5792_v63  ;;  %v2717_v48 = vmax.f32 %v2589_v2, 0.0 }
 0x208   :  { %v2720_v25 = vmax.f32 %v2592_v31, 0.0 }
 0x209   :  { %v2718_v16 = vmax.f32 %v2590_v29, 0.0  ;;  %v4236_v26 = vpop.f32.mrb[44].mxu0 }
 0x20a   :  { %v6001_v11 = vpack.c.bf16 %v2720_v25, %v2719_v38  ;;  %v4512_v57 = vadd.f32 %v4236_v26, %v6422_v40  ;;  %v2079_v13 = vpop.f32.mrb[45].mxu0  ;;  %v6425_v40 = vld [vmem:[#allocation25_spill] sm:$0xff] }
 0x20b   :  { %v6004_v54 = vpack.c.bf16 %v2718_v16, %v2717_v48  ;;  %v4513_v34 = vadd.f32 %v2079_v13, %v5653_v30  ;;  %v4237_v9 = vpop.f32.mrb[46].mxu0  ;;  %v6011_v2 = vpop.f32.mrb[116].mxu1 }
 0x20c   :  { %v2595_v3 = vadd.f32 %v4512_v57, %v5792_v63  ;;  %v4514_v21 = vadd.f32 %v4237_v9, %v5655_v33  ;;  %v2082_v37 = vpop.f32.mrb[47].mxu0  ;;  %v6014_v51 = vpop.f32.mrb[117].mxu1 }
 0x20d   :  { %v2593_v56 = vadd.f32 %v4513_v34, %v5792_v63  ;;  %v4515_v36 = vadd.f32 %v2082_v37, %v6423_v47  ;;  %v6017_v29 = vpop.f32.mrb[118].mxu1 }
 0x20e   :  { %v2596_v22 = vadd.f32 %v4514_v21, %v5792_v63  ;;  %v2723_v30 = vmax.f32 %v2595_v3, 0.0  ;;  %v6019_v25 = vpop.f32.mrb[119].mxu1 }
 0x20f   :  { %v2594_v31 = vadd.f32 %v4515_v36, %v5792_v63  ;;  %6424 = vst [vmem:[#allocation8_spill] sm:$0xff] %v6019_v25  ;;  %v2721_v33 = vmax.f32 %v2593_v56, 0.0  ;;  %v6426_v56 = vld [vmem:[#allocation26_spill] sm:$0xff] }
 0x210   :  { %v2724_v38 = vmax.f32 %v2596_v22, 0.0 }
 0x211   :  { %v2722_v48 = vmax.f32 %v2594_v31, 0.0  ;;  %v4240_v16 = vpop.f32.mrb[48].mxu0 }
 0x212   :  { %v6021_v26 = vpack.c.bf16 %v2724_v38, %v2723_v30  ;;  %v4516_v57 = vadd.f32 %v4240_v16, %v6425_v40  ;;  %v2095_v13 = vpop.f32.mrb[49].mxu0 }
 0x213   :  { %v6024_v34 = vpack.c.bf16 %v2722_v48, %v2721_v33  ;;  %v4517_v9 = vadd.f32 %v2095_v13, %v5665_v42  ;;  %v4241_v21 = vpop.f32.mrb[50].mxu0  ;;  %v6031_v31 = vpop.f32.mrb[120].mxu1 }
 0x214   :  { %v2599_v37 = vadd.f32 %v4516_v57, %v5792_v63  ;;  %v4518_v3 = vadd.f32 %v4241_v21, %v5667_v35  ;;  %v2098_v47 = vpop.f32.mrb[51].mxu0  ;;  %6427 = vst [vmem:[#allocation9_spill] sm:$0xff] %v6031_v31  ;;  %v6034_v38 = vpop.f32.mrb[121].mxu1 }
 0x215   :  { %v2597_v36 = vadd.f32 %v4517_v9, %v5792_v63  ;;  %v4519_v22 = vadd.f32 %v2098_v47, %v6426_v56  ;;  %6428 = vst [vmem:[#allocation10_spill] sm:$0xff] %v6034_v38  ;;  %v6037_v48 = vpop.f32.mrb[122].mxu1  ;;  %v6431_v9 = vld [vmem:[#allocation27_spill] sm:$0xff] }
 0x216   :  { %v2600_v30 = vadd.f32 %v4518_v3, %v5792_v63  ;;  %6429 = vst [vmem:[#allocation11_spill] sm:$0xff] %v6037_v48  ;;  %v2727_v42 = vmax.f32 %v2599_v37, 0.0  ;;  %v6039_v40 = vpop.f32.mrb[123].mxu1 }
 0x217   :  { %v2598_v33 = vadd.f32 %v4519_v22, %v5792_v63  ;;  %6430 = vst [vmem:[#allocation12_spill] sm:$0xff] %v6039_v40  ;;  %v2725_v35 = vmax.f32 %v2597_v36, 0.0 }
 0x218   :  { %v2728_v16 = vmax.f32 %v2600_v30, 0.0  ;;  %v6432_v30 = vld [vmem:[#allocation28_spill] sm:$0xff] }
 0x219   :  { %v2726_v57 = vmax.f32 %v2598_v33, 0.0  ;;  %v4244_v13 = vpop.f32.mrb[52].mxu0 }
 0x21a   :  { %v4520_v21 = vadd.f32 %v4244_v13, %v6431_v9  ;;  %v2111_v47 = vpop.f32.mrb[53].mxu0  ;;  %v4374_v56 = vpack.c.bf16 %v2728_v16, %v2727_v42  ;;  %v6433_v13 = vld [vmem:[#allocation29_spill] sm:$0xff] }
 0x21b   :  { %v4521_v31 = vadd.f32 %v2111_v47, %v5677_v44  ;;  %v4245_v3 = vpop.f32.mrb[54].mxu0  ;;  %v4370_v25 = vpack.c.bf16 %v2726_v57, %v2725_v35  ;;  %v6047_v36 = vpop.f32.mrb[124].mxu1 }
 0x21c   :  { %v2603_v38 = vadd.f32 %v4520_v21, %v5792_v63  ;;  %v4522_v22 = vadd.f32 %v4245_v3, %v5679_v41  ;;  %v2114_v48 = vpop.f32.mrb[55].mxu0  ;;  %v6051_v42 = vpop.f32.mrb[125].mxu1 }
 0x21d   :  { %v2601_v37 = vadd.f32 %v4521_v31, %v5792_v63  ;;  %v4523_v40 = vadd.f32 %v2114_v48, %v6432_v30  ;;  %4371 = vmatprep.subr.bf16.mxu1 %v4370_v25  ;;  %v6054_v16 = vpop.f32.mrb[126].mxu1 }
 0x21e   :  { %v2604_v33 = vadd.f32 %v4522_v22, %v5792_v63  ;;  %4373 = vmatpush3.bf16.msra.mxu1 %v5962_v32  ;;  %v2731_v41 = vmax.f32 %v2603_v38, 0.0  ;;  %v6056_v57 = vpop.f32.mrb[127].mxu1 }
 0x21f   :  { %v2602_v44 = vadd.f32 %v4523_v40, %v5792_v63  ;;  %4375 = vmatprep.subr.bf16.mxu1 %v4374_v56  ;;  %v2729_v31 = vmax.f32 %v2601_v37, 0.0  ;;  %v6434_v37 = vld [vmem:[#allocation30_spill] sm:$0xff] }
 0x220   :  { %v2732_v35 = vmax.f32 %v2604_v33, 0.0 }
 0x221   :  { %v2730_v48 = vmax.f32 %v2602_v44, 0.0  ;;  %v4248_v25 = vpop.f32.mrb[56].mxu0 }
 0x222   :  { %v4524_v9 = vadd.f32 %v4248_v25, %v6433_v13  ;;  %v2127_v21 = vpop.f32.mrb[57].mxu0  ;;  %4377 = vmatpush3.bf16.msra.mxu1 %v5958_v58  ;;  %v4382_v32 = vpack.c.bf16 %v2732_v35, %v2731_v41  ;;  %v6435_v25 = vld [vmem:[#allocation31_spill] sm:$0xff] }
 0x223   :  { %v4525_v47 = vadd.f32 %v2127_v21, %v5689_v46  ;;  %v4249_v3 = vpop.f32.mrb[58].mxu0  ;;  %v4378_v40 = vpack.c.bf16 %v2730_v48, %v2729_v31  ;;  %v6436_v21 = vld [vmem:[#allocation32_spill] sm:$0xff] }
 0x224   :  { %v2607_v56 = vadd.f32 %v4524_v9, %v5792_v63  ;;  %v4526_v38 = vadd.f32 %v4249_v3, %v5691_v43  ;;  %v2130_v22 = vpop.f32.mrb[59].mxu0 }
 0x225   :  { %v2605_v30 = vadd.f32 %v4525_v47, %v5792_v63  ;;  %v4527_v33 = vadd.f32 %v2130_v22, %v6434_v37  ;;  %4379 = vmatprep.subr.bf16.mxu1 %v4378_v40 }
 0x226   :  { %v2608_v44 = vadd.f32 %v4526_v38, %v5792_v63  ;;  %4381 = vmatpush3.bf16.msra.mxu1 %v5984_v15  ;;  %v2735_v46 = vmax.f32 %v2607_v56, 0.0  ;;  %v6437_v38 = vld [vmem:[#allocation33_spill] sm:$0xff] }
 0x227   :  { %v2606_v58 = vadd.f32 %v4527_v33, %v5792_v63  ;;  %4383 = vmatprep.subr.bf16.mxu1 %v4382_v32  ;;  %v2733_v35 = vmax.f32 %v2605_v30, 0.0  ;;  %v6438_v30 = vld [vmem:[#allocation34_spill] sm:$0xff] }
 0x228   :  { %v2736_v41 = vmax.f32 %v2608_v44, 0.0 }
 0x229   :  { %v2734_v31 = vmax.f32 %v2606_v58, 0.0  ;;  %v4252_v48 = vpop.f32.mrb[60].mxu0 }
 0x22a   :  { %v4528_v43 = vadd.f32 %v4252_v48, %v6435_v25  ;;  %v2143_v13 = vpop.f32.mrb[61].mxu0  ;;  %4385 = vmatpush3.bf16.msra.mxu1 %v5981_v39  ;;  %v4390_v9 = vpack.c.bf16 %v2736_v41, %v2735_v46 }
 0x22b   :  { %v4529_v47 = vadd.f32 %v2143_v13, %v6436_v21  ;;  %v4253_v3 = vpop.f32.mrb[62].mxu0  ;;  %v4386_v40 = vpack.c.bf16 %v2734_v31, %v2733_v35  ;;  %v6439_v31 = vld [vmem:[#allocation35_spill] sm:$0xff]  ;;  %v6440_v13 = vld [vmem:[#allocation36_spill] sm:$0xff] }
 0x22c   :  { %v2611_v15 = vadd.f32 %v4528_v43, %v5792_v63  ;;  %v4530_v22 = vadd.f32 %v4253_v3, %v6437_v38  ;;  %v2146_v32 = vpop.f32.mrb[63].mxu0 }
 0x22d   :  { %v2609_v56 = vadd.f32 %v4529_v47, %v5792_v63  ;;  %v4531_v37 = vadd.f32 %v2146_v32, %v6438_v30  ;;  %4387 = vmatprep.subr.bf16.mxu1 %v4386_v40 }
 0x22e   :  { %v2612_v33 = vadd.f32 %v4530_v22, %v5792_v63  ;;  %4389 = vmatpush3.bf16.msra.mxu1 %v6004_v54  ;;  %v2739_v44 = vmax.f32 %v2611_v15, 0.0  ;;  %v2808_v54 = vadd.s32 256, %v5741_v53  ;;  %v2811_v22 = vadd.s32 640, %v5741_v53 }
 0x22f   :  { %v2610_v39 = vadd.f32 %v4531_v37, %v5792_v63  ;;  %4391 = vmatprep.subr.bf16.mxu1 %v4390_v9  ;;  %v2737_v46 = vmax.f32 %v2609_v56, 0.0  ;;  %v6441_v9 = vld [vmem:[#allocation37_spill] sm:$0xff]  ;;  %v6442_v56 = vld [vmem:[#allocation38_spill] sm:$0xff] }
 0x230   :  { %v2740_v58 = vmax.f32 %v2612_v33, 0.0  ;;  %vm2819_vm11 = vcmp.ge.s32.totalorder %v2808_v54, %v5748_v45  ;;  %vm2829_vm12 = vcmp.lt.s32.totalorder %v2808_v54, %v5750_v49  ;;  %vm2822_vm13 = vcmp.ge.s32.totalorder %v2811_v22, %v5748_v45 }
 0x231   :  { %v2738_v41 = vmax.f32 %v2610_v39, 0.0  ;;  %v4256_v35 = vpop.f32.mrb[64].mxu0  ;;  %vm2832_vm14 = vcmp.lt.s32.totalorder %v2811_v22, %v5750_v49  ;;  %vm2837_vm15 = vmand %vm2819_vm11, %vm2829_vm12  ;;  %vm4867_vm11 = vmmov 0   ;;  %vm3131_vm12 = vcmask 257024  }
 0x232   :  { %v4532_v48 = vadd.f32 %v4256_v35, %v6439_v31  ;;  %v2159_v25 = vpop.f32.mrb[65].mxu0  ;;  %4393 = vmatpush3.bf16.msra.mxu1 %v6001_v11  ;;  %v4398_v43 = vpack.c.bf16 %v2740_v58, %v2739_v44  ;;  %v6443_v35 = vld [vmem:[#allocation39_spill] sm:$0xff]  ;;  %vm2840_vm0 = vmand %vm2822_vm13, %vm2832_vm14 }
 0x233   :  { %v4533_v21 = vadd.f32 %v2159_v25, %v6440_v13  ;;  %v4257_v47 = vpop.f32.mrb[66].mxu0  ;;  %v4394_v3 = vpack.c.bf16 %v2738_v41, %v2737_v46  ;;  %v6444_v25 = vld [vmem:[#allocation40_spill] sm:$0xff] }
 0x234   :  { %v2615_v40 = vadd.f32 %v4532_v48, %v5792_v63  ;;  %v4534_v15 = vadd.f32 %v4257_v47, %v6441_v9  ;;  %v2162_v38 = vpop.f32.mrb[67].mxu0  ;;  %v6445_v47 = vld [vmem:[#allocation41_spill] sm:$0xff]  ;;  %v6446_v9 = vld [vmem:[#allocation42_spill] sm:$0xff] }
 0x235   :  { %v2613_v32 = vadd.f32 %v4533_v21, %v5792_v63  ;;  %v4535_v30 = vadd.f32 %v2162_v38, %v6442_v56  ;;  %4395 = vmatprep.subr.bf16.mxu1 %v4394_v3 }
 0x236   :  { %v2616_v11 = vadd.f32 %v4534_v15, %v5792_v63  ;;  %4397 = vmatpush3.bf16.msra.mxu1 %v6024_v34  ;;  %v2743_v33 = vmax.f32 %v2615_v40, 0.0 }
 0x237   :  { %v2614_v37 = vadd.f32 %v4535_v30, %v5792_v63  ;;  %4399 = vmatprep.subr.bf16.mxu1 %v4398_v43  ;;  %v2741_v44 = vmax.f32 %v2613_v32, 0.0 }
 0x238   :  { %v2744_v39 = vmax.f32 %v2616_v11, 0.0 }
 0x239   :  { %v2742_v58 = vmax.f32 %v2614_v37, 0.0  ;;  %v4260_v46 = vpop.f32.mrb[68].mxu0 }
 0x23a   :  { %v6094_v41 = vpack.c.bf16 %v2744_v39, %v2743_v33  ;;  %v4536_v34 = vadd.f32 %v4260_v46, %v6443_v35  ;;  %v2175_v31 = vpop.f32.mrb[69].mxu0  ;;  %4401 = vmatpush3.bf16.msra.mxu1 %v6021_v26 }
 0x23b   :  { %v6098_v48 = vpack.c.bf16 %v2742_v58, %v2741_v44  ;;  %v4537_v43 = vadd.f32 %v2175_v31, %v6444_v25  ;;  %v4261_v13 = vpop.f32.mrb[70].mxu0 }
 0x23c   :  { %v2619_v21 = vadd.f32 %v4536_v34, %v5792_v63  ;;  %v4538_v3 = vadd.f32 %v4261_v13, %v6445_v47  ;;  %v2178_v54 = vpop.f32.mrb[71].mxu0 }
 0x23d   :  { %v2617_v40 = vadd.f32 %v4537_v43, %v5792_v63  ;;  %v4539_v15 = vadd.f32 %v2178_v54, %v6446_v9  ;;  %3569 = vmatmul.mubr.msk.f32.vlgmr.msra.gmra.mrb[130].mxu1 %vm2837_vm15, %v6419_v28  ;;  %v6447_v43 = vld [vmem:[#allocation43_spill] sm:$0xff] }
 0x23e   :  { %v2620_v26 = vadd.f32 %v4538_v3, %v5792_v63  ;;  %3570 = vmatprep.mubr.msk.f32.mxu1 %vm2840_vm0, %v6419_v28  ;;  %v2747_v22 = vmax.f32 %v2619_v21, 0.0 }
 0x23f   :  { %v2618_v38 = vadd.f32 %v4539_v15, %v5792_v63  ;;  %v2745_v56 = vmax.f32 %v2617_v40, 0.0  ;;  %v6448_v15 = vld [vmem:[#allocation44_spill] sm:$0xff] }
 0x240   :  { %v2748_v32 = vmax.f32 %v2620_v26, 0.0 }
 0x241   :  { %v2746_v30 = vmax.f32 %v2618_v38, 0.0  ;;  %v4264_v11 = vpop.f32.mrb[72].mxu0 }
 0x242   :  { %v6109_v37 = vpack.c.bf16 %v2748_v32, %v2747_v22  ;;  %v4540_v33 = vadd.f32 %v4264_v11, %v5735_v55  ;;  %v2191_v39 = vpop.f32.mrb[73].mxu0  ;;  %v6449_v22 = vld [vmem:[#allocation45_spill] sm:$0xff]  ;;  %v6450_v11 = vld [vmem:[#allocation46_spill] sm:$0xff] }
 0x243   :  { %v6112_v44 = vpack.c.bf16 %v2746_v30, %v2745_v56  ;;  %v4541_v58 = vadd.f32 %v2191_v39, %v5739_v62  ;;  %v4265_v46 = vpop.f32.mrb[74].mxu0 }
 0x244   :  { %v2623_v35 = vadd.f32 %v4540_v33, %v5792_v63  ;;  %v4542_v34 = vadd.f32 %v4265_v46, %v5743_v52  ;;  %v2194_v31 = vpop.f32.mrb[75].mxu0  ;;  %v6451_v46 = vld [vmem:[#allocation47_spill] sm:$0xff] }
 0x245   :  { %v2621_v25 = vadd.f32 %v4541_v58, %v5792_v63  ;;  %v4543_v13 = vadd.f32 %v2194_v31, %v6447_v43 }
 0x246   :  { %v2624_v21 = vadd.f32 %v4542_v34, %v5792_v63  ;;  %v2751_v55 = vmax.f32 %v2623_v35, 0.0 }
 0x247   :  { %v2622_v47 = vadd.f32 %v4543_v13, %v5792_v63  ;;  %v2749_v54 = vmax.f32 %v2621_v25, 0.0 }
 0x248   :  { %v2752_v3 = vmax.f32 %v2624_v21, 0.0 }
 0x249   :  { %v2750_v40 = vmax.f32 %v2622_v47, 0.0  ;;  %v4268_v9 = vpop.f32.mrb[76].mxu0 }
 0x24a   :  { %v6121_v62 = vpack.c.bf16 %v2752_v3, %v2751_v55  ;;  %v4544_v26 = vadd.f32 %v4268_v9, %v6448_v15  ;;  %v2207_v38 = vpop.f32.mrb[77].mxu0  ;;  %v6452_v3 = vld [vmem:[#allocation48_spill] sm:$0xff]  ;;  %v6453_v15 = vld [vmem:[#allocation49_spill] sm:$0xff] }
 0x24b   :  { %v6124_v52 = vpack.c.bf16 %v2750_v40, %v2749_v54  ;;  %v4545_v32 = vadd.f32 %v2207_v38, %v6449_v22  ;;  %v4269_v56 = vpop.f32.mrb[78].mxu0 }
 0x24c   :  { %v2627_v30 = vadd.f32 %v4544_v26, %v5792_v63  ;;  %v4546_v33 = vadd.f32 %v4269_v56, %v6450_v11  ;;  %v2210_v39 = vpop.f32.mrb[79].mxu0 }
 0x24d   :  { %v2625_v58 = vadd.f32 %v4545_v32, %v5792_v63  ;;  %v4547_v35 = vadd.f32 %v2210_v39, %v6451_v46  ;;  %v6454_v32 = vld [vmem:[#allocation50_spill] sm:$0xff] }
 0x24e   :  { %v2628_v34 = vadd.f32 %v4546_v33, %v5792_v63  ;;  %v2755_v25 = vmax.f32 %v2627_v30, 0.0  ;;  %v6455_v33 = vld [vmem:[#allocation51_spill] sm:$0xff] }
 0x24f   :  { %v2626_v31 = vadd.f32 %v4547_v35, %v5792_v63  ;;  %v2753_v13 = vmax.f32 %v2625_v58, 0.0 }
 0x250   :  { %v2756_v43 = vmax.f32 %v2628_v34, 0.0 }
 0x251   :  { %v2754_v21 = vmax.f32 %v2626_v31, 0.0  ;;  %v4272_v47 = vpop.f32.mrb[80].mxu0 }
 0x252   :  { %v6133_v55 = vpack.c.bf16 %v2756_v43, %v2755_v25  ;;  %v4548_v54 = vadd.f32 %v4272_v47, %v6452_v3  ;;  %v2223_v40 = vpop.f32.mrb[81].mxu0 }
 0x253   :  { %v6136_v9 = vpack.c.bf16 %v2754_v21, %v2753_v13  ;;  %v4549_v26 = vadd.f32 %v2223_v40, %v6453_v15  ;;  %v4273_v38 = vpop.f32.mrb[82].mxu0  ;;  %v6456_v13 = vld [vmem:[#allocation52_spill] sm:$0xff] }
 0x254   :  { %v2631_v22 = vadd.f32 %v4548_v54, %v5792_v63  ;;  %v4550_v56 = vadd.f32 %v4273_v38, %v6454_v32  ;;  %v2226_v11 = vpop.f32.mrb[83].mxu0  ;;  %v6457_v54 = vld [vmem:[#allocation53_spill] sm:$0xff]  ;;  %v6458_v32 = vld [vmem:[#allocation54_spill] sm:$0xff] }
 0x255   :  { %v2629_v30 = vadd.f32 %v4549_v26, %v5792_v63  ;;  %v4551_v39 = vadd.f32 %v2226_v11, %v6455_v33 }
 0x256   :  { %v2632_v58 = vadd.f32 %v4550_v56, %v5792_v63  ;;  %v2759_v35 = vmax.f32 %v2631_v22, 0.0  ;;  %v6459_v22 = vld [vmem:[#allocation55_spill] sm:$0xff] }
 0x257   :  { %v2630_v46 = vadd.f32 %v4551_v39, %v5792_v63  ;;  %v2757_v31 = vmax.f32 %v2629_v30, 0.0 }
 0x258   :  { %v2760_v34 = vmax.f32 %v2632_v58, 0.0 }
 0x259   :  { %v2758_v25 = vmax.f32 %v2630_v46, 0.0  ;;  %v4276_v43 = vpop.f32.mrb[84].mxu0 }
 0x25a   :  { %v4552_v21 = vadd.f32 %v4276_v43, %v6456_v13  ;;  %v2239_v47 = vpop.f32.mrb[85].mxu0  ;;  %v4406_v3 = vpack.c.bf16 %v2760_v34, %v2759_v35  ;;  %v6460_v43 = vld [vmem:[#allocation56_spill] sm:$0xff] }
 0x25b   :  { %v4553_v40 = vadd.f32 %v2239_v47, %v6457_v54  ;;  %v4277_v15 = vpop.f32.mrb[86].mxu0  ;;  %v4402_v38 = vpack.c.bf16 %v2758_v25, %v2757_v31 }
 0x25c   :  { %v2635_v26 = vadd.f32 %v4552_v21, %v5792_v63  ;;  %v4554_v11 = vadd.f32 %v4277_v15, %v6458_v32  ;;  %v2242_v56 = vpop.f32.mrb[87].mxu0 }
 0x25d   :  { %v2633_v33 = vadd.f32 %v4553_v40, %v5792_v63  ;;  %v4555_v39 = vadd.f32 %v2242_v56, %v6459_v22  ;;  %4403 = vmatprep.subr.bf16.mxu1 %v4402_v38  ;;  %v6461_v38 = vld [vmem:[#allocation57_spill] sm:$0xff]  ;;  %v6164_v56 = vld [vmem:[%s6344_s2] ss:$0 sm:$0xff] }
 0x25e   :  { %v2636_v30 = vadd.f32 %v4554_v11, %v5792_v63  ;;  %4405 = vmatpush3.bf16.msra.mxu1 %v6098_v48  ;;  %v2763_v46 = vmax.f32 %v2635_v26, 0.0 }
 0x25f   :  { %v2634_v58 = vadd.f32 %v4555_v39, %v5792_v63  ;;  %4407 = vmatprep.subr.bf16.mxu1 %v4406_v3  ;;  %v2761_v34 = vmax.f32 %v2633_v33, 0.0 }
 0x260   :  { %v2764_v35 = vmax.f32 %v2636_v30, 0.0 }
 0x261   :  { %v2762_v31 = vmax.f32 %v2634_v58, 0.0  ;;  %v4280_v25 = vpop.f32.mrb[88].mxu0 }
 0x262   :  { %v4556_v13 = vadd.f32 %v4280_v25, %v6460_v43  ;;  %v2255_v21 = vpop.f32.mrb[89].mxu0  ;;  %4409 = vmatpush3.bf16.msra.mxu1 %v6094_v41  ;;  %v4414_v47 = vpack.c.bf16 %v2764_v35, %v2763_v46 }
 0x263   :  { %v4557_v54 = vadd.f32 %v2255_v21, %v5810_v6  ;;  %v4281_v40 = vpop.f32.mrb[90].mxu0  ;;  %v4410_v15 = vpack.c.bf16 %v2762_v31, %v2761_v34 }
 0x264   :  { %v2639_v48 = vadd.f32 %v4556_v13, %v5792_v63  ;;  %v4558_v32 = vadd.f32 %v4281_v40, %v6461_v38  ;;  %v2258_v3 = vpop.f32.mrb[91].mxu0 }
 0x265   :  { %v2637_v26 = vadd.f32 %v4557_v54, %v5792_v63  ;;  %v4559_v11 = vadd.f32 %v2258_v3, %v5814_v60  ;;  %4411 = vmatprep.subr.bf16.mxu1 %v4410_v15 }
 0x266   :  { %v2640_v41 = vadd.f32 %v6164_v56, %v4558_v32  ;;  %4413 = vmatpush3.bf16.msra.mxu1 %v6112_v44  ;;  %v2767_v33 = vmax.f32 %v2639_v48, 0.0 }
 0x267   :  { %v2638_v6 = vadd.f32 %v6164_v56, %v4559_v11  ;;  %4415 = vmatprep.subr.bf16.mxu1 %v4414_v47  ;;  %v2765_v39 = vmax.f32 %v2637_v26, 0.0 }
 0x268   :  { %v2768_v22 = vmax.f32 %v2640_v41, 0.0 }
 0x269   :  { %v2766_v30 = vmax.f32 %v2638_v6, 0.0  ;;  %v4284_v63 = vpop.f32.mrb[92].mxu0  ;;  %v2813_v6 = vadd.s32 896, %v5741_v53 }
 0x26a   :  { %v4560_v60 = vadd.f32 %v4284_v63, %v5829_v10  ;;  %v2271_v58 = vpop.f32.mrb[93].mxu0  ;;  %4417 = vmatpush3.bf16.msra.mxu1 %v6109_v37  ;;  %v4422_v46 = vpack.c.bf16 %v2768_v22, %v2767_v33 }
 0x26b   :  { %v4561_v35 = vadd.f32 %v2271_v58, %v5834_v12  ;;  %v4285_v34 = vpop.f32.mrb[94].mxu0  ;;  %v4418_v31 = vpack.c.bf16 %v2766_v30, %v2765_v39  ;;  %vm2824_vm3 = vcmp.ge.s32.totalorder %v2813_v6, %v5748_v45  ;;  %vm2834_vm4 = vcmp.lt.s32.totalorder %v2813_v6, %v5750_v49 }
 0x26c   :  { %v2643_v44 = vadd.f32 %v6164_v56, %v4560_v60  ;;  %v4562_v25 = vadd.f32 %v4285_v34, %v5836_v59  ;;  %v2274_v43 = vpop.f32.mrb[95].mxu0  ;;  %vm2842_vm6 = vmand %vm2824_vm3, %vm2834_vm4 }
 0x26d   :  { %v2641_v13 = vadd.f32 %v6164_v56, %v4561_v35  ;;  %v4563_v21 = vadd.f32 %v2274_v43, %v5838_v50  ;;  %4419 = vmatprep.subr.bf16.mxu1 %v4418_v31  ;;  %v6462_v31 = vld [vmem:[#allocation58_spill] sm:$0xff] }
 0x26e   :  { %v2644_v10 = vadd.f32 %v6164_v56, %v4562_v25  ;;  %4421 = vmatpush3.bf16.msra.mxu1 %v6124_v52  ;;  %v2771_v12 = vmax.f32 %v2643_v44, 0.0  ;;  %v2810_v52 = vadd.s32 512, %v5741_v53 }
 0x26f   :  { %v2642_v37 = vadd.f32 %v6164_v56, %v4563_v21  ;;  %4423 = vmatprep.subr.bf16.mxu1 %v4422_v46  ;;  %v2769_v54 = vmax.f32 %v2641_v13, 0.0  ;;  %v6463_v13 = vld [vmem:[#allocation59_spill] sm:$0xff] }
 0x270   :  { %v2772_v47 = vmax.f32 %v2644_v10, 0.0  ;;  %vm2821_vm1 = vcmp.ge.s32.totalorder %v2810_v52, %v5748_v45  ;;  %vm2831_vm2 = vcmp.lt.s32.totalorder %v2810_v52, %v5750_v49  ;;  %v6466_v52 = vld [vmem:[#allocation62_spill] sm:$0xff] }
 0x271   :  { %v2770_v40 = vmax.f32 %v2642_v37, 0.0  ;;  %v4288_v15 = vpop.f32.mrb[96].mxu0  ;;  %vm2839_vm5 = vmand %vm2821_vm1, %vm2831_vm2 }
 0x272   :  { %v4564_v59 = vadd.f32 %v4288_v15, %v5853_v17  ;;  %v2287_v48 = vpop.f32.mrb[97].mxu0  ;;  %4425 = vmatpush3.bf16.msra.mxu1 %v6121_v62  ;;  %v4430_v38 = vpack.c.bf16 %v2772_v47, %v2771_v12 }
 0x273   :  { %v4565_v50 = vadd.f32 %v2287_v48, %v5858_v19  ;;  %v4289_v32 = vpop.f32.mrb[98].mxu0  ;;  %v4426_v3 = vpack.c.bf16 %v2770_v40, %v2769_v54  ;;  %v6464_v40 = vld [vmem:[#allocation60_spill] sm:$0xff] }
 0x274   :  { %v2647_v26 = vadd.f32 %v6164_v56, %v4564_v59  ;;  %v4566_v11 = vadd.f32 %v4289_v32, %v5860_v14  ;;  %v2290_v41 = vpop.f32.mrb[99].mxu0 }
 0x275   :  { %v2645_v33 = vadd.f32 %v6164_v56, %v4565_v50  ;;  %v4567_v17 = vadd.f32 %v2290_v41, %v5862_v0  ;;  %4427 = vmatprep.subr.bf16.mxu1 %v4426_v3 }
 0x276   :  { %v2648_v62 = vadd.f32 %v6164_v56, %v4566_v11  ;;  %4429 = vmatpush3.bf16.msra.mxu1 %v6136_v9  ;;  %v2775_v14 = vmax.f32 %v2647_v26, 0.0 }
 0x277   :  { %v2646_v19 = vadd.f32 %v6164_v56, %v4567_v17  ;;  %4431 = vmatprep.subr.bf16.mxu1 %v4430_v38  ;;  %v2773_v39 = vmax.f32 %v2645_v33, 0.0  ;;  %v6465_v38 = vld [vmem:[#allocation61_spill] sm:$0xff] }
 0x278   :  { %v2776_v22 = vmax.f32 %v2648_v62, 0.0 }
 0x279   :  { %v2774_v0 = vmax.f32 %v2646_v19, 0.0  ;;  %v4292_v30 = vpop.f32.mrb[100].mxu0 }
 0x27a   :  { %v6195_v63 = vpack.c.bf16 %v2776_v22, %v2775_v14  ;;  %v4568_v9 = vadd.f32 %v4292_v30, %v5877_v23  ;;  %v2303_v60 = vpop.f32.mrb[101].mxu0  ;;  %4433 = vmatpush3.bf16.msra.mxu1 %v6133_v55 }
 0x27b   :  { %v6199_v58 = vpack.c.bf16 %v2774_v0, %v2773_v39  ;;  %v4569_v46 = vadd.f32 %v2303_v60, %v5882_v24  ;;  %v4293_v35 = vpop.f32.mrb[102].mxu0 }
 0x27c   :  { %v2651_v34 = vadd.f32 %v6164_v56, %v4568_v9  ;;  %v4570_v44 = vadd.f32 %v4293_v35, %v6462_v31  ;;  %v2306_v25 = vpop.f32.mrb[103].mxu0 }
 0x27d   :  { %v2649_v43 = vadd.f32 %v6164_v56, %v4569_v46  ;;  %v4571_v21 = vadd.f32 %v2306_v25, %v6463_v13  ;;  %3571 = vmatmul.mubr.msk.f32.vlgmr.msra.gmra.mrb[132].mxu1 %vm2839_vm5, %v6419_v28 }
 0x27e   :  { %v2652_v23 = vadd.f32 %v6164_v56, %v4570_v44  ;;  %3572 = vmatprep.mubr.msk.f32.mxu1 %vm2842_vm6, %v6419_v28  ;;  %v2779_v24 = vmax.f32 %v2651_v34, 0.0 }
 0x27f   :  { %v2650_v55 = vadd.f32 %v6164_v56, %v4571_v21  ;;  %v2777_v37 = vmax.f32 %v2649_v43, 0.0 }
 0x280   :  { %v2780_v10 = vmax.f32 %v2652_v23, 0.0 }
 0x281   :  { %v2778_v12 = vmax.f32 %v2650_v55, 0.0  ;;  %v4296_v47 = vpop.f32.mrb[104].mxu0 }
 0x282   :  { %v6210_v54 = vpack.c.bf16 %v2780_v10, %v2779_v24  ;;  %v4572_v15 = vadd.f32 %v4296_v47, %v6464_v40  ;;  %v2319_v59 = vpop.f32.mrb[105].mxu0 }
 0x283   :  { %v6213_v48 = vpack.c.bf16 %v2778_v12, %v2777_v37  ;;  %v4573_v50 = vadd.f32 %v2319_v59, %v6465_v38  ;;  %v4297_v32 = vpop.f32.mrb[106].mxu0 }
 0x284   :  { %v2655_v3 = vadd.f32 %v6164_v56, %v4572_v15  ;;  %v4574_v26 = vadd.f32 %v4297_v32, %v6466_v52  ;;  %v2322_v11 = vpop.f32.mrb[107].mxu0 }
 0x285   :  { %v2653_v41 = vadd.f32 %v6164_v56, %v4573_v50  ;;  %v4575_v6 = vadd.f32 %v2322_v11, %v5910_v1 }
 0x286   :  { %v2656_v33 = vadd.f32 %v6164_v56, %v4574_v26  ;;  %v2783_v62 = vmax.f32 %v2655_v3, 0.0 }
 0x287   :  { %v2654_v17 = vadd.f32 %v6164_v56, %v4575_v6  ;;  %v2781_v14 = vmax.f32 %v2653_v41, 0.0 }
 0x288   :  { %v2784_v19 = vmax.f32 %v2656_v33, 0.0 }
 0x289   :  { %v2782_v22 = vmax.f32 %v2654_v17, 0.0  ;;  %v4300_v39 = vpop.f32.mrb[108].mxu0 }
 0x28a   :  { %v6222_v0 = vpack.c.bf16 %v2784_v19, %v2783_v62  ;;  %v4576_v30 = vadd.f32 %v4300_v39, %v5970_v5  ;;  %v2335_v9 = vpop.f32.mrb[109].mxu0 }
 0x28b   :  { %v6225_v60 = vpack.c.bf16 %v2782_v22, %v2781_v14  ;;  %v4577_v46 = vadd.f32 %v2335_v9, %v5974_v27  ;;  %v4301_v35 = vpop.f32.mrb[110].mxu0  ;;  %v6467_v22 = vld [vmem:[#allocation8_spill] sm:$0xff] }
 0x28c   :  { %v2659_v1 = vadd.f32 %v6164_v56, %v4576_v30  ;;  %v4578_v34 = vadd.f32 %v4301_v35, %v5977_v4  ;;  %v2338_v31 = vpop.f32.mrb[111].mxu0 }
 0x28d   :  { %v2657_v44 = vadd.f32 %v6164_v56, %v4577_v46  ;;  %v4579_v25 = vadd.f32 %v2338_v31, %v5979_v7 }
 0x28e   :  { %v2660_v43 = vadd.f32 %v6164_v56, %v4578_v34  ;;  %v2787_v5 = vmax.f32 %v2659_v1, 0.0  ;;  %v6468_v34 = vld [vmem:[#allocation9_spill] sm:$0xff] }
 0x28f   :  { %v2658_v13 = vadd.f32 %v6164_v56, %v4579_v25  ;;  %v2785_v23 = vmax.f32 %v2657_v44, 0.0  ;;  %v6469_v25 = vld [vmem:[#allocation10_spill] sm:$0xff] }
 0x290   :  { %v2788_v21 = vmax.f32 %v2660_v43, 0.0 }
 0x291   :  { %v2786_v55 = vmax.f32 %v2658_v13, 0.0  ;;  %v4304_v24 = vpop.f32.mrb[112].mxu0 }
 0x292   :  { %v6234_v27 = vpack.c.bf16 %v2788_v21, %v2787_v5  ;;  %v4580_v10 = vadd.f32 %v4304_v24, %v5991_v20  ;;  %v2351_v37 = vpop.f32.mrb[113].mxu0  ;;  %v6470_v21 = vld [vmem:[#allocation11_spill] sm:$0xff] }
 0x293   :  { %v6237_v4 = vpack.c.bf16 %v2786_v55, %v2785_v23  ;;  %v4581_v12 = vadd.f32 %v2351_v37, %v5994_v18  ;;  %v4305_v47 = vpop.f32.mrb[114].mxu0 }
 0x294   :  { %v2663_v7 = vadd.f32 %v6164_v56, %v4580_v10  ;;  %v4582_v40 = vadd.f32 %v4305_v47, %v5997_v61  ;;  %v2354_v15 = vpop.f32.mrb[115].mxu0  ;;  %v6471_v10 = vld [vmem:[#allocation12_spill] sm:$0xff] }
 0x295   :  { %v2661_v59 = vadd.f32 %v6164_v56, %v4581_v12  ;;  %v4583_v38 = vadd.f32 %v2354_v15, %v5999_v8 }
 0x296   :  { %v2664_v50 = vadd.f32 %v6164_v56, %v4582_v40  ;;  %v2791_v20 = vmax.f32 %v2663_v7, 0.0 }
 0x297   :  { %v2662_v32 = vadd.f32 %v6164_v56, %v4583_v38  ;;  %v2789_v52 = vmax.f32 %v2661_v59, 0.0 }
 0x298   :  { %v2792_v3 = vmax.f32 %v2664_v50, 0.0 }
 0x299   :  { %v2790_v26 = vmax.f32 %v2662_v32, 0.0  ;;  %v4308_v11 = vpop.f32.mrb[116].mxu0 }
 0x29a   :  { %v4584_v18 = vadd.f32 %v4308_v11, %v6011_v2  ;;  %v2367_v41 = vpop.f32.mrb[117].mxu0  ;;  %v4438_v6 = vpack.c.bf16 %v2792_v3, %v2791_v20 }
 0x29b   :  { %v4585_v61 = vadd.f32 %v2367_v41, %v6014_v51  ;;  %v4309_v33 = vpop.f32.mrb[118].mxu0  ;;  %v4434_v17 = vpack.c.bf16 %v2790_v26, %v2789_v52 }
 0x29c   :  { %v2667_v62 = vadd.f32 %v6164_v56, %v4584_v18  ;;  %v4586_v8 = vadd.f32 %v4309_v33, %v6017_v29  ;;  %v2370_v19 = vpop.f32.mrb[119].mxu0 }
 0x29d   :  { %v2665_v14 = vadd.f32 %v6164_v56, %v4585_v61  ;;  %v4587_v39 = vadd.f32 %v2370_v19, %v6467_v22  ;;  %4435 = vmatprep.subr.bf16.mxu1 %v4434_v17 }
 0x29e   :  { %v2668_v30 = vadd.f32 %v6164_v56, %v4586_v8  ;;  %4437 = vmatpush3.bf16.msra.mxu1 %v6199_v58  ;;  %v2795_v51 = vmax.f32 %v2667_v62, 0.0  ;;  %v2812_v62 = vadd.s32 768, %v5741_v53  ;;  %v4808_v53 = vld [vmem:[%s6345_s3] sm:$0xff]   ;;  %v4811_v8 = vld [vmem:[%s6345_s3 + $0x18] sm:$0xff]  }
 0x29f   :  { %v2666_v2 = vadd.f32 %v6164_v56, %v4587_v39  ;;  %4439 = vmatprep.subr.bf16.mxu1 %v4438_v6  ;;  %v2793_v46 = vmax.f32 %v2665_v14, 0.0  ;;  %v3211_v19 = vsel %vm3197_vm10, %v4811_v8, 0  ;;  %v4812_v14 = vld [vmem:[%s6345_s3 + $0x20] sm:$0xff]   ;;  %v4813_v39 = vld [vmem:[%s6345_s3 + $0x28] sm:$0xff]  }
 0x2a0   :  { %v2796_v9 = vmax.f32 %v2668_v30, 0.0  ;;  %vm2823_vm7 = vcmp.ge.s32.totalorder %v2812_v62, %v5748_v45  ;;  %vm2833_vm8 = vcmp.lt.s32.totalorder %v2812_v62, %v5750_v49  ;;  %v4809_v45 = vld [vmem:[%s6345_s3 + $0x8] sm:$0xff]   ;;  %v3214_v22 = vsel %vm3197_vm10, %v4812_v14, 0 }
 0x2a1   :  { %v2794_v35 = vmax.f32 %v2666_v2, 0.0  ;;  %v4312_v1 = vpop.f32.mrb[120].mxu0  ;;  %vm2841_vm9 = vmand %vm2823_vm7, %vm2833_vm8  ;;  %v3205_v49 = vsel %vm3197_vm10, %v4809_v45, 0  ;;  %v3217_v30 = vsel %vm3197_vm10, %v4813_v39, 0  ;;  %v4814_v2 = vld [vmem:[%s6345_s3 + $0x30] sm:$0xff]  }
 0x2a2   :  { %v4588_v29 = vadd.f32 %v4312_v1, %v6468_v34  ;;  %v2383_v31 = vpop.f32.mrb[121].mxu0  ;;  %4441 = vmatpush3.bf16.msra.mxu1 %v6195_v63  ;;  %v4446_v44 = vpack.c.bf16 %v2796_v9, %v2795_v51  ;;  %v3220_v51 = vsel %vm3197_vm10, %v4814_v2, 0  ;;  %v4815_v9 = vld [vmem:[%s6345_s3 + $0x38] sm:$0xff]  }
 0x2a3   :  { %v4589_v43 = vadd.f32 %v2383_v31, %v6469_v25  ;;  %v4313_v13 = vpop.f32.mrb[122].mxu0  ;;  %v4442_v5 = vpack.c.bf16 %v2794_v35, %v2793_v46  ;;  %v3223_v35 = vsel %vm3197_vm10, %v4815_v9, 0 }
 0x2a4   :  { %v2671_v58 = vadd.f32 %v6164_v56, %v4588_v29  ;;  %v4590_v23 = vadd.f32 %v4313_v13, %v6470_v21  ;;  %v2386_v55 = vpop.f32.mrb[123].mxu0 }
 0x2a5   :  { %v2669_v24 = vadd.f32 %v6164_v56, %v4589_v43  ;;  %v4591_v37 = vadd.f32 %v2386_v55, %v6471_v10  ;;  %4443 = vmatprep.subr.bf16.mxu1 %v4442_v5 }
 0x2a6   :  { %v2672_v12 = vadd.f32 %v6164_v56, %v4590_v23  ;;  %4445 = vmatpush3.bf16.msra.mxu1 %v6213_v48  ;;  %v2799_v47 = vmax.f32 %v2671_v58, 0.0 }
 0x2a7   :  { %v2670_v63 = vadd.f32 %v6164_v56, %v4591_v37  ;;  %4447 = vmatprep.subr.bf16.mxu1 %v4446_v44  ;;  %v2797_v40 = vmax.f32 %v2669_v24, 0.0 }
 0x2a8   :  { %v2800_v7 = vmax.f32 %v2672_v12, 0.0 }
 0x2a9   :  { %v2798_v15 = vmax.f32 %v2670_v63, 0.0  ;;  %v4316_v59 = vpop.f32.mrb[124].mxu0 }
 0x2aa   :  { %v4592_v38 = vadd.f32 %v4316_v59, %v6047_v36  ;;  %v2399_v50 = vpop.f32.mrb[125].mxu0  ;;  %4449 = vmatpush3.bf16.msra.mxu1 %v6210_v54  ;;  %v4454_v32 = vpack.c.bf16 %v2800_v7, %v2799_v47 }
 0x2ab   :  { %v4593_v20 = vadd.f32 %v2399_v50, %v6051_v42  ;;  %v4317_v3 = vpop.f32.mrb[126].mxu0  ;;  %v4450_v52 = vpack.c.bf16 %v2798_v15, %v2797_v40 }
 0x2ac   :  { %v2675_v48 = vadd.f32 %v6164_v56, %v4592_v38  ;;  %v4594_v26 = vadd.f32 %v4317_v3, %v6054_v16  ;;  %v2402_v11 = vpop.f32.mrb[127].mxu0 }
 0x2ad   :  { %v2673_v18 = vadd.f32 %v6164_v56, %v4593_v20  ;;  %v4595_v41 = vadd.f32 %v2402_v11, %v6056_v57  ;;  %4451 = vmatprep.subr.bf16.mxu1 %v4450_v52 }
 0x2ae   :  { %v2676_v36 = vadd.f32 %v6164_v56, %v4594_v26  ;;  %4453 = vmatpush3.bf16.msra.mxu1 %v6225_v60  ;;  %v2803_v42 = vmax.f32 %v2675_v48, 0.0  ;;  %v4866_v60 = vmov 0.0  }
 0x2af   :  { %v2674_v54 = vadd.f32 %v6164_v56, %v4595_v41  ;;  %4455 = vmatprep.subr.bf16.mxu1 %v4454_v32  ;;  %v2801_v61 = vmax.f32 %v2673_v18, 0.0 }
 0x2b0   :  { %v2804_v6 = vmax.f32 %v2676_v36, 0.0 }
 0x2b1   :  { %v2802_v33 = vmax.f32 %v2674_v54, 0.0 }
 0x2b2   :  { %4457 = vmatpush3.bf16.msra.mxu1 %v6222_v0  ;;  %v4462_v16 = vpack.c.bf16 %v2804_v6, %v2803_v42 }
 0x2b3   :  { %v4458_v17 = vpack.c.bf16 %v2802_v33, %v2801_v61 }
 0x2b5   :  { %4459 = vmatprep.subr.bf16.mxu1 %v4458_v17 }
 0x2b6   :  { %4461 = vmatpush3.bf16.msra.mxu1 %v6237_v4  ;;  %v3202_v4 = vsel %vm3197_vm10, %v4808_v53, 0 }
 0x2b7   :  { %4463 = vmatprep.subr.bf16.mxu1 %v4462_v16 }
 0x2ba   :  { %4465 = vmatpush3.bf16.msra.mxu1 %v6234_v27 }
 0x2bb   :  { %4318 = vmatprep.subr.bf16.mxu1 %v4866_v60 }
 0x2bd   :  { %3573 = vmatmul.mubr.msk.f32.vlgmr.msra.gmra.mrb[134].mxu1 %vm2841_vm9, %v6419_v28  ;;  %v4810_v28 = vld [vmem:[%s6345_s3 + $0x10] sm:$0xff]   ;;  %s4868_s3 = smov [#allocation2]  }
 0x2be   :  { %v3208_v27 = vsel %vm3197_vm10, %v4810_v28, 0  ;;  %4334 = vmatprep.mubr.msk.bf16.mxu1 %vm4867_vm11, %v4866_v60  ;;  %s3272_s15 = sshll.u32 %s4868_s3, 4  ;;  %s3273_s15 = int_to_ptr.vmem [resolvable:$true] %s3272_s15 }
 0x2bf   :  { %s4817_s16 = scalar_lea.vmem %s3273_s15, 64  ;;  %p4822_p1 = scmp.lt.s32.totalorder %s3273_s15, %s3273_s15 }
 0x2c0   :  { %p4818_p0 = scmp.ne.s32.totalorder %s3273_s15, %s4817_s16  ;;  %p4823_p2 = scmp.lt.s32.totalorder %s4817_s16, %s4817_s16 }
 0x2c2   :  { %p4824_p3 = por %p4823_p2, %p4822_p1 }
 0x2c3   :  { %4319 = vmatpush3.bf16.xpose.msra.mxu1 %v3202_v4 }
 0x2c4   :  { %4320 = vmatprep.subr.bf16.mxu1 %v4866_v60  ;;  %p4825_p4 = pnand %p4824_p3, %p4818_p0 }
 0x2cb   :  { %4321 = vmatpush3.bf16.xpose.msra.mxu1 %v3205_v49 }
 0x2cc   :  { %4322 = vmatprep.subr.bf16.mxu1 %v4866_v60 }
 0x2d0   :  { %v3811_v57 = vpop.f32.mrb[128].mxu1 }
 0x2d1   :  { %v3812_v56 = vpop.f32.mrb[129].mxu1 }
 0x2d2   :  { %v3813_v0 = vadd.f32 %v3812_v56, %v3811_v57 }
 0x2d3   :  { %4323 = vmatpush3.bf16.xpose.msra.mxu1 %v3208_v27 }
 0x2d4   :  { %4324 = vmatprep.subr.bf16.mxu1 %v4866_v60 }
 0x2db   :  { %4325 = vmatpush3.bf16.xpose.msra.mxu1 %v3211_v19 }
 0x2dc   :  { %4326 = vmatprep.subr.bf16.mxu1 %v4866_v60 }
 0x2e3   :  { %4327 = vmatpush3.bf16.xpose.msra.mxu1 %v3214_v22 }
 0x2e4   :  { %4328 = vmatprep.subr.bf16.mxu1 %v4866_v60 }
 0x2eb   :  { %4329 = vmatpush3.bf16.xpose.msra.mxu1 %v3217_v30 }
 0x2ec   :  { %4330 = vmatprep.subr.bf16.mxu1 %v4866_v60 }
 0x2f3   :  { %4331 = vmatpush3.bf16.xpose.msra.mxu1 %v3220_v51 }
 0x2f4   :  { %4332 = vmatprep.subr.bf16.mxu1 %v4866_v60 }
 0x2fb   :  { %4333 = vmatpush3.bf16.xpose.msra.mxu1 %v3223_v35 }
 0x310   :  { %v3846_v46 = vpop.f32.mrb[130].mxu1 }
 0x311   :  { %v3847_v1 = vpop.f32.mrb[131].mxu1 }
 0x312   :  { %v3848_v34 = vadd.f32 %v3847_v1, %v3846_v46 }
 0x314   :  { %v2988_v29 = vadd.f32 %v3848_v34, %v3813_v0 }
 0x350   :  { %v3881_v31 = vpop.f32.mrb[132].mxu1 }
 0x351   :  { %v3882_v44 = vpop.f32.mrb[133].mxu1 }
 0x352   :  { %v3883_v25 = vadd.f32 %v3882_v44, %v3881_v31 }
 0x354   :  { %v3058_v43 = vadd.f32 %v3883_v25, %v2988_v29 }
 0x390   :  { %v3916_v13 = vpop.f32.mrb[134].mxu1 }
 0x391   :  { %v3917_v5 = vpop.f32.mrb[135].mxu1 }
 0x392   :  { %v3918_v58 = vadd.f32 %v3917_v5, %v3916_v13 }
 0x394   :  { %v3128_v21 = vadd.f32 %v3918_v58, %v3058_v43 }
 0x396   :  { %v3133_v23 = vpack.c.bf16 %v3128_v21, %v3128_v21  ;;  %3132 = vst.msk [vmem:[#allocation2] sm:$0xf] %vm3131_vm12, %v3128_v21 }
 0x398   :  { %4335 = vmatmul.mubr.msk.bf16.vlgmr.msra.gmra.mrb[136].mxu1 %vm3197_vm10, %v3133_v23 }
 0x399   :  { %4828 = shalt.err (!%p4825_p4)
}
 0x39a   :  { %s4829_s19 = scalar_lea.hbm %s6347_s5, 64 }
 0x39b   :  { %p4830_p5 = scmp.ne.s32.totalorder %s6347_s5, %s4829_s19  ;;  %p4833_p6 = scmp.lt.u32.totalorder %s4829_s19, %s6347_s5 }
 0x39d   :  { %p4835_p7 = pnand %p4833_p6, %p4830_p5 }
 0x39f   :  { %4838 = shalt.err (!%p4835_p7)
}
 0x3a0   :  { %3275 = dma.vmem_to_hbm [thread:$0]  %s3273_s15, 64, %s6347_s5, [#allocation3]   ;;  %v3574_v55 = vld [vmem:[%s6346_s4] ss:$0 sm:$0xff] }
 0x3a1   :  { %s4869_s26 = smov [#allocation4]  }
 0x3a2   :  { %s3282_s1 = sshll.u32 %s4869_s26, 4  ;;  %s3283_s1 = int_to_ptr.vmem [resolvable:$true] %s3282_s1 }
 0x3a3   :  { %s4839_s27 = scalar_lea.vmem %s3283_s1, 64  ;;  %p4844_p9 = scmp.lt.s32.totalorder %s3283_s1, %s3283_s1 }
 0x3a4   :  { %p4840_p8 = scmp.ne.s32.totalorder %s3283_s1, %s4839_s27  ;;  %p4845_p10 = scmp.lt.s32.totalorder %s4839_s27, %s4839_s27 }
 0x3a6   :  { %p4846_p11 = por %p4845_p10, %p4844_p9 }
 0x3a8   :  { %p4847_p12 = pnand %p4846_p11, %p4840_p8 }
 0x46b   :  { %v3259_v24 = vpop.f32.mrb[136].mxu1 }
 0x46c   :  { %v3260_v10 = vadd.f32 %v3574_v55, %v3259_v24  ;;  %v4336_v37 = vpop.f32.mrb[137].mxu1 }
 0x46d   :  { %v3262_v12 = vpop.f32.mrb[138].mxu1 }
 0x46e   :  { %3265 = vst [vmem:[#allocation4] sm:$0xf] %v3260_v10  ;;  %v4337_v63 = vpop.f32.mrb[139].mxu1 }
 0x46f   :  { %4850 = shalt.err (!%p4847_p12)
}
 0x470   :  { %s4851_s4 = scalar_lea.hbm %s6348_s6, 64 }
 0x471   :  { %p4852_p13 = scmp.ne.s32.totalorder %s6348_s6, %s4851_s4  ;;  %p4855_p0 = scmp.lt.u32.totalorder %s4851_s4, %s6348_s6 }
 0x473   :  { %p4857_p1 = pnand %p4855_p0, %p4852_p13 }
 0x475   :  { %4860 = shalt.err (!%p4857_p1)
}
 0x476   :  { %3285 = dma.vmem_to_hbm [thread:$0]  %s3283_s1, 64, %s6348_s6, [#allocation5]  }
 0x477   :  { %4861 = dma.done.wait [#allocation3], 64  }
 0x478   :  { %4862 = vsyncadd [#allocation3], 4294967232 }
 0x479   :  { %4863 = dma.done.wait [#allocation5], 64  }
 0x47a   :  { %4864 = vsyncadd [#allocation5], 4294967232 }
 0x47b   :  { %3292 = vsyncpa [#allocation3], 1 }
 0x47c   :  { %3293 = vsyncpa [#allocation5], 1 }

</bundles_post_ra>
